<compile_context>
chip_gen: v7x
topology: tpu7x:2x2x1
jax: 0.10.0
libtpu: 0.0.40
codegen_flags: <defaults>
</compile_context>

<pallas_src>
import functools

import jax
import jax.numpy as jnp
from jax import lax
from jax.experimental import pallas as pl
from jax.experimental.pallas import tpu as pltpu


# Geometry implied by the PyTorch module: fc expects 3*10*10 = 300 flattened
# features -> input spatial must be 10x10; conv1 (pad=2) -> 12x12, conv2 -> 10x10.
_H_IN = 10
_H1 = 12           # conv1 output spatial
_H2 = 10           # conv2 output spatial
_C1 = 6            # conv1 out channels
_C2 = 3            # conv2 out channels

_N1 = _C1 * _H1 * _H1          # 864  (conv1 flattened features)
_N2 = _C2 * _H2 * _H2          # 300  (conv2 flattened features == fc1 in)
_F1, _F2 = 150, 40


def _round128(n):
    return ((n + 127) // 128) * 128


_N1P = _round128(_N1)   # 896
_N2P = _round128(_N2)   # 384
_F1P = _round128(_F1)   # 256
_F2P = _round128(_F2)   # 128
_OUTP = 128             # padded width of the final (lane-dense) output store

# Packed-bias lane offsets (all multiples of 128 -> lane-aligned static slices).
_B1_OFF = 0
_B2_OFF = _B1_OFF + _N1P        # 896
_B3_OFF = _B2_OFF + _N2P        # 1280
_B4_OFF = _B3_OFF + _F1P        # 1536
_B5_OFF = _B4_OFF + _F2P        # 1664
_BTOT = _B5_OFF + _OUTP         # 1792


# ----------------------------------------------------------------------------
# Fused Pallas kernel: conv1+ReLU, conv2+ReLU, fc1+ReLU, fc2+ReLU, fc3.
# Weights are bf16, biases fp32, accumulation fp32 on the MXU.
# ----------------------------------------------------------------------------
def _fused_forward_kernel(x_ref, w1_ref, w2_ref, w3_ref, w4_ref, w5_ref,
                          b_ref, o_ref):
    h = jnp.dot(x_ref[...], w1_ref[...], preferred_element_type=jnp.float32)
    h = jnp.maximum(h + b_ref[:, _B1_OFF:_B2_OFF], 0.0)
    h = jnp.dot(h.astype(jnp.bfloat16), w2_ref[...],
                preferred_element_type=jnp.float32)
    h = jnp.maximum(h + b_ref[:, _B2_OFF:_B3_OFF], 0.0)
    h = jnp.dot(h.astype(jnp.bfloat16), w3_ref[...],
                preferred_element_type=jnp.float32)
    h = jnp.maximum(h + b_ref[:, _B3_OFF:_B4_OFF], 0.0)
    h = jnp.dot(h.astype(jnp.bfloat16), w4_ref[...],
                preferred_element_type=jnp.float32)
    h = jnp.maximum(h + b_ref[:, _B4_OFF:_B5_OFF], 0.0)
    o_ref[...] = (jnp.dot(h.astype(jnp.bfloat16), w5_ref[...],
                          preferred_element_type=jnp.float32)
                  + b_ref[:, _B5_OFF:_BTOT])


def _vmem():
    return pl.BlockSpec(memory_space=pltpu.MemorySpace.VMEM)


# ----------------------------------------------------------------------------
# One-time parameter preprocessing (init time, NOT in the forward path).
# ----------------------------------------------------------------------------
def _pad2d(w, rows, cols):
    return jnp.zeros((rows, cols), jnp.float32).at[: w.shape[0], : w.shape[1]].set(w)


def prepare_params(params, input_dim, output_dim):
    """Fold both convs into dense matrices, lane-pad to 128, cast weights to bf16.

    The dense conv operators are built by pushing the identity basis through the
    convolution (pure weight preprocessing, runs once).  Their column ordering is
    the row-major (C, H, W) flatten — exactly PyTorch's .view(B, -1) order — so
    fc1 consumes the result with no permutation in the forward pass.  All five
    bias rows are packed into a single fp32 array at 128-aligned lane offsets.
    """
    assert output_dim <= _OUTP
    dn = ("NCHW", "OIHW", "NCHW")
    n_in = input_dim * _H_IN * _H_IN
    n_in_p = _round128(n_in)

    eye1 = jnp.eye(n_in, dtype=jnp.float32).reshape(n_in, input_dim, _H_IN, _H_IN)
    w1_dense = lax.conv_general_dilated(
        eye1, params["w_conv1"], (1, 1), [(2, 2), (2, 2)], dimension_numbers=dn
    ).reshape(n_in, _N1)                                    # (Cin*100, 864)

    eye2 = jnp.eye(_N1, dtype=jnp.float32).reshape(_N1, _C1, _H1, _H1)
    w2_dense = lax.conv_general_dilated(
        eye2, params["w_conv2"], (1, 1), [(0, 0), (0, 0)], dimension_numbers=dn
    ).reshape(_N1, _N2)                                     # (864, 300)

    bias = jnp.zeros((1, _BTOT), jnp.float32)
    bias = bias.at[0, _B1_OFF:_B1_OFF + _N1].set(
        jnp.repeat(params["b_conv1"], _H1 * _H1))
    bias = bias.at[0, _B2_OFF:_B2_OFF + _N2].set(
        jnp.repeat(params["b_conv2"], _H2 * _H2))
    bias = bias.at[0, _B3_OFF:_B3_OFF + _F1].set(params["b_fc1"])
    bias = bias.at[0, _B4_OFF:_B4_OFF + _F2].set(params["b_fc2"])
    bias = bias.at[0, _B5_OFF:_B5_OFF + output_dim].set(params["b_fc3"])

    return {
        "w1": _pad2d(w1_dense, n_in_p, _N1P).astype(jnp.bfloat16),
        "w2": _pad2d(w2_dense, _N1P, _N2P).astype(jnp.bfloat16),
        "w3": _pad2d(params["w_fc1"], _N2P, _F1P).astype(jnp.bfloat16),
        "w4": _pad2d(params["w_fc2"], _F1P, _F2P).astype(jnp.bfloat16),
        "w5": _pad2d(params["w_fc3"], _F2P, _OUTP).astype(jnp.bfloat16),
        "b": bias,                                          # fp32, packed
    }


# ----------------------------------------------------------------------------
# Forward pass: reshape + pad x, one fused pallas_call, one column slice.
# ----------------------------------------------------------------------------
@functools.partial(jax.jit, static_argnums=(2,))
def c_net_forward(prep, x_nchw, output_dim):
    B = x_nchw.shape[0]
    n_in_p = prep["w1"].shape[0]
    # Row-major NCHW flatten (metadata-only); conv zero padding is baked into w1.
    x_flat = x_nchw.astype(jnp.bfloat16).reshape(B, -1)
    x_flat = jnp.pad(x_flat, ((0, 0), (0, n_in_p - x_flat.shape[1])))
    out_padded = pl.pallas_call(
        _fused_forward_kernel,
        out_shape=jax.ShapeDtypeStruct((B, _OUTP), jnp.float32),
        in_specs=[_vmem()] * 7,
        out_specs=_vmem(),
        # Gridless on purpose: at small B the kernel is weight-DMA/launch bound;
        # a grid would only add ~0.35 us/step sequential overhead.
    )(
        x_flat,
        prep["w1"], prep["w2"], prep["w3"], prep["w4"], prep["w5"],
        prep["b"],
    )
    return out_padded[:, :output_dim]


# ----------------------------------------------------------------------------
# Pure-JAX reference (mirrors PyTorch semantics, fp32) for correctness check.
# ----------------------------------------------------------------------------
def c_net_reference(params, x_nchw):
    x = x_nchw.astype(jnp.float32)
    dn = ("NCHW", "OIHW", "NCHW")
    h = lax.conv_general_dilated(x, params["w_conv1"], (1, 1),
                                 [(2, 2), (2, 2)], dimension_numbers=dn)
    h = jnp.maximum(h + params["b_conv1"][None, :, None, None], 0.0)
    h = lax.conv_general_dilated(h, params["w_conv2"], (1, 1),
                                 [(0, 0), (0, 0)], dimension_numbers=dn)
    h = jnp.maximum(h + params["b_conv2"][None, :, None, None], 0.0)
    flat = h.reshape(h.shape[0], -1)
    h = jnp.maximum(flat @ params["w_fc1"] + params["b_fc1"], 0.0)
    h = jnp.maximum(h @ params["w_fc2"] + params["b_fc2"], 0.0)
    return h @ params["w_fc3"] + params["b_fc3"]


def init_params(key, input_dim, output_dim):
    ks = jax.random.split(key, 10)
    s = 0.1
    return {
        "w_conv1": s * jax.random.normal(ks[0], (6, input_dim, 3, 3), jnp.float32),
        "b_conv1": s * jax.random.normal(ks[1], (6,), jnp.float32),
        "w_conv2": s * jax.random.normal(ks[2], (3, 6, 3, 3), jnp.float32),
        "b_conv2": s * jax.random.normal(ks[3], (3,), jnp.float32),
        "w_fc1": s * jax.random.normal(ks[4], (300, 150), jnp.float32),
        "b_fc1": s * jax.random.normal(ks[5], (150,), jnp.float32),
        "w_fc2": s * jax.random.normal(ks[6], (150, 40), jnp.float32),
        "b_fc2": s * jax.random.normal(ks[7], (40,), jnp.float32),
        "w_fc3": s * jax.random.normal(ks[8], (40, output_dim), jnp.float32),
        "b_fc3": s * jax.random.normal(ks[9], (output_dim,), jnp.float32),
    }


if __name__ == "__main__":
    # fc expects 300 = 3 * 10 * 10 flattened features -> input spatial is 10x10.
    batch, input_dim, output_dim = 2, 4, 5
    key = jax.random.PRNGKey(0)
    pkey, xkey = jax.random.split(key)
    params = init_params(pkey, input_dim, output_dim)
    x = jax.random.normal(xkey, (batch, input_dim, _H_IN, _H_IN), jnp.float32)

    prep = prepare_params(params, input_dim, output_dim)   # one-time weight prep

    out = jax.block_until_ready(c_net_forward(prep, x, output_dim))
    ref = jax.block_until_ready(c_net_reference(params, x))

    assert out.shape == (batch, output_dim), out.shape
    # bf16 weights/activations in the kernel vs fp32 reference -> loosened tol.
    assert jnp.allclose(out, ref, atol=3e-2, rtol=3e-2), "mismatch vs reference"
    print("KERNEL_OK")
</pallas_src>

<mosaic_0001>
module attributes {stable_mosaic.version = 11 : i64} {
  func.func @_fused_forward_kernel(%arg0: memref<2x512xbf16, #tpu.memory_space<vmem>>, %arg1: memref<512x896xbf16, #tpu.memory_space<vmem>>, %arg2: memref<896x384xbf16, #tpu.memory_space<vmem>>, %arg3: memref<384x256xbf16, #tpu.memory_space<vmem>>, %arg4: memref<256x128xbf16, #tpu.memory_space<vmem>>, %arg5: memref<128x128xbf16, #tpu.memory_space<vmem>>, %arg6: memref<1x1792xf32, #tpu.memory_space<vmem>>, %arg7: memref<2x128xf32, #tpu.memory_space<vmem>>) attributes {dimension_semantics = [], scalar_prefetch = 0 : i64, scratch_operands = 0 : i64, tpu.core_type = #tpu.core_type<tc>} {
    %c0 = arith.constant 0 : index
    %c0_0 = arith.constant 0 : index
    %0 = vector.load %arg0[%c0, %c0_0] : memref<2x512xbf16, #tpu.memory_space<vmem>>, vector<2x512xbf16>
    %c0_1 = arith.constant 0 : index
    %c0_2 = arith.constant 0 : index
    %1 = vector.load %arg1[%c0_1, %c0_2] : memref<512x896xbf16, #tpu.memory_space<vmem>>, vector<512x896xbf16>
    %cst = arith.constant dense<0.000000e+00> : vector<2x896xf32>
    %2 = tpu.matmul %0, %1, %cst {dimension_numbers = #tpu.dot_dimension_numbers<[1], [0], [0], [1], [0, 0, 1, 1], [], []>} : vector<2x512xbf16>, vector<512x896xbf16>, vector<2x896xf32> -> vector<2x896xf32>
    %c0_3 = arith.constant 0 : index
    %c0_4 = arith.constant 0 : index
    %3 = vector.load %arg6[%c0_3, %c0_4] : memref<1x1792xf32, #tpu.memory_space<vmem>>, vector<1x896xf32>
    %4 = vector.broadcast %3 : vector<1x896xf32> to vector<2x896xf32>
    %5 = arith.addf %2, %4 : vector<2x896xf32>
    %cst_5 = arith.constant 0.000000e+00 : f32
    %6 = vector.broadcast %cst_5 : f32 to vector<2x896xf32>
    %7 = arith.maximumf %5, %6 : vector<2x896xf32>
    %8 = arith.truncf %7 : vector<2x896xf32> to vector<2x896xbf16>
    %c0_6 = arith.constant 0 : index
    %c0_7 = arith.constant 0 : index
    %9 = vector.load %arg2[%c0_6, %c0_7] : memref<896x384xbf16, #tpu.memory_space<vmem>>, vector<896x384xbf16>
    %cst_8 = arith.constant dense<0.000000e+00> : vector<2x384xf32>
    %10 = tpu.matmul %8, %9, %cst_8 {dimension_numbers = #tpu.dot_dimension_numbers<[1], [0], [0], [1], [0, 0, 1, 1], [], []>} : vector<2x896xbf16>, vector<896x384xbf16>, vector<2x384xf32> -> vector<2x384xf32>
    %c0_9 = arith.constant 0 : index
    %c896 = arith.constant 896 : index
    %11 = vector.load %arg6[%c0_9, %c896] : memref<1x1792xf32, #tpu.memory_space<vmem>>, vector<1x384xf32>
    %12 = vector.broadcast %11 : vector<1x384xf32> to vector<2x384xf32>
    %13 = arith.addf %10, %12 : vector<2x384xf32>
    %cst_10 = arith.constant 0.000000e+00 : f32
    %14 = vector.broadcast %cst_10 : f32 to vector<2x384xf32>
    %15 = arith.maximumf %13, %14 : vector<2x384xf32>
    %16 = arith.truncf %15 : vector<2x384xf32> to vector<2x384xbf16>
    %c0_11 = arith.constant 0 : index
    %c0_12 = arith.constant 0 : index
    %17 = vector.load %arg3[%c0_11, %c0_12] : memref<384x256xbf16, #tpu.memory_space<vmem>>, vector<384x256xbf16>
    %cst_13 = arith.constant dense<0.000000e+00> : vector<2x256xf32>
    %18 = tpu.matmul %16, %17, %cst_13 {dimension_numbers = #tpu.dot_dimension_numbers<[1], [0], [0], [1], [0, 0, 1, 1], [], []>} : vector<2x384xbf16>, vector<384x256xbf16>, vector<2x256xf32> -> vector<2x256xf32>
    %c0_14 = arith.constant 0 : index
    %c1280 = arith.constant 1280 : index
    %19 = vector.load %arg6[%c0_14, %c1280] : memref<1x1792xf32, #tpu.memory_space<vmem>>, vector<1x256xf32>
    %20 = vector.broadcast %19 : vector<1x256xf32> to vector<2x256xf32>
    %21 = arith.addf %18, %20 : vector<2x256xf32>
    %cst_15 = arith.constant 0.000000e+00 : f32
    %22 = vector.broadcast %cst_15 : f32 to vector<2x256xf32>
    %23 = arith.maximumf %21, %22 : vector<2x256xf32>
    %24 = arith.truncf %23 : vector<2x256xf32> to vector<2x256xbf16>
    %c0_16 = arith.constant 0 : index
    %c0_17 = arith.constant 0 : index
    %25 = vector.load %arg4[%c0_16, %c0_17] : memref<256x128xbf16, #tpu.memory_space<vmem>>, vector<256x128xbf16>
    %cst_18 = arith.constant dense<0.000000e+00> : vector<2x128xf32>
    %26 = tpu.matmul %24, %25, %cst_18 {dimension_numbers = #tpu.dot_dimension_numbers<[1], [0], [0], [1], [0, 0, 1, 1], [], []>} : vector<2x256xbf16>, vector<256x128xbf16>, vector<2x128xf32> -> vector<2x128xf32>
    %c0_19 = arith.constant 0 : index
    %c1536 = arith.constant 1536 : index
    %27 = vector.load %arg6[%c0_19, %c1536] : memref<1x1792xf32, #tpu.memory_space<vmem>>, vector<1x128xf32>
    %28 = vector.broadcast %27 : vector<1x128xf32> to vector<2x128xf32>
    %29 = arith.addf %26, %28 : vector<2x128xf32>
    %cst_20 = arith.constant 0.000000e+00 : f32
    %30 = vector.broadcast %cst_20 : f32 to vector<2x128xf32>
    %31 = arith.maximumf %29, %30 : vector<2x128xf32>
    %32 = arith.truncf %31 : vector<2x128xf32> to vector<2x128xbf16>
    %c0_21 = arith.constant 0 : index
    %c0_22 = arith.constant 0 : index
    %33 = vector.load %arg5[%c0_21, %c0_22] : memref<128x128xbf16, #tpu.memory_space<vmem>>, vector<128x128xbf16>
    %cst_23 = arith.constant dense<0.000000e+00> : vector<2x128xf32>
    %34 = tpu.matmul %32, %33, %cst_23 {dimension_numbers = #tpu.dot_dimension_numbers<[1], [0], [0], [1], [0, 0, 1, 1], [], []>} : vector<2x128xbf16>, vector<128x128xbf16>, vector<2x128xf32> -> vector<2x128xf32>
    %c0_24 = arith.constant 0 : index
    %c1664 = arith.constant 1664 : index
    %35 = vector.load %arg6[%c0_24, %c1664] : memref<1x1792xf32, #tpu.memory_space<vmem>>, vector<1x128xf32>
    %36 = vector.broadcast %35 : vector<1x128xf32> to vector<2x128xf32>
    %37 = arith.addf %34, %36 : vector<2x128xf32>
    %c0_25 = arith.constant 0 : index
    %c0_26 = arith.constant 0 : index
    %38 = vector.load %arg7[%c0_25, %c0_26] : memref<2x128xf32, #tpu.memory_space<vmem>>, vector<2x128xf32>
    tpu.vector_store %arg7[%c0_25, %c0_26], %37 {strides = array<i32>} : memref<2x128xf32, #tpu.memory_space<vmem>>, vector<2x128xf32>,
    return
  }
}

</mosaic_0001>

<bundles_post_ra>
// kernel: c_net_forward.1
= control target key start
LH: loop header
LB: loop body
LE: loop exit
PB: predicated region body
PF: predicated region fallthrough
CT: control target
= control target key end

     0   :  { %12 = vsyncpa [#allocation3], 0  ;;  %s5773_s0 = inlined_call_operand.vmem [shape: bf16[2,512], index: 0, kind: input, shape index: {}]   ;;  %s5774_s1 = inlined_call_operand.hbm [shape: bf16[512,896], index: 1, kind: input, shape index: {}]   ;;  %s5775_s2 = inlined_call_operand.hbm [shape: bf16[896,384], index: 2, kind: input, shape index: {}]   ;;  %s5776_s3 = inlined_call_operand.hbm [shape: bf16[384,256], index: 3, kind: input, shape index: {}]   ;;  %s5777_s4 = inlined_call_operand.vmem [shape: bf16[256,128], index: 4, kind: input, shape index: {}]   ;;  %s5778_s5 = inlined_call_operand.vmem [shape: bf16[128,128], index: 5, kind: input, shape index: {}]   ;;  %s5779_s6 = inlined_call_operand.vmem [shape: f32[1,1792], index: 6, kind: input, shape index: {}]   ;;  %s5780_s7 = inlined_call_operand.hbm [shape: f32[2,128], index: 7, kind: output, shape index: {}]  }
   0x1   :  { %13 = vsyncpa [#allocation6], 0 }
   0x2   :  { %14 = vsyncpa [#allocation4], 0  ;;  %s5485_s24 = smov [#allocation5]   ;;  %s5391_s28 = scalar_lea.hbm %s5775_s2, 21504 }
   0x3   :  { %s34_s25 = sshll.u32 %s5485_s24, 4  ;;  %p5392_p0 = scmp.ne.s32.totalorder %s5775_s2, %s5391_s28  ;;  %s35_s25 = int_to_ptr.vmem [resolvable:$true] %s34_s25 }
   0x4   :  { %p5395_p1 = scmp.lt.u32.totalorder %s5391_s28, %s5775_s2 }
   0x6   :  { %p5397_p2 = pnand %p5395_p1, %p5392_p0 }
   0x8   :  { %5400 = shalt.err (!%p5397_p2)
}
   0x9   :  { %s5401_s10 = scalar_lea.vmem %s35_s25, 21504  ;;  %p5406_p4 = scmp.lt.s32.totalorder %s35_s25, %s35_s25 }
   0xa   :  { %p5402_p3 = scmp.ne.s32.totalorder %s35_s25, %s5401_s10  ;;  %p5407_p5 = scmp.lt.s32.totalorder %s5401_s10, %s5401_s10 }
   0xc   :  { %p5408_p6 = por %p5407_p5, %p5406_p4 }
   0xe   :  { %p5409_p7 = pnand %p5408_p6, %p5402_p3 }
  0x10   :  { %5412 = shalt.err (!%p5409_p7)
}
  0x11   :  { %s5486_s11 = smov 192   ;;  %s5487_s12 = smov 12  }
  0x12   :  { %40 = dma.hbm_to_vmem [thread:$0]  %s5775_s2, 21504, %s35_s25, [#allocation6], %s5486_s11, %s5486_s11, %s5487_s12  }
  0x13   :  { %s5488_s15 = smov [#allocation2]   ;;  %s5413_s19 = scalar_lea.hbm %s5774_s1, 28672 }
  0x14   :  { %s22_s16 = sshll.u32 %s5488_s15, 4  ;;  %p5414_p8 = scmp.ne.s32.totalorder %s5774_s1, %s5413_s19  ;;  %s23_s16 = int_to_ptr.vmem [resolvable:$true] %s22_s16 }
  0x15   :  { %p5417_p9 = scmp.lt.u32.totalorder %s5413_s19, %s5774_s1 }
  0x17   :  { %p5419_p10 = pnand %p5417_p9, %p5414_p8 }
  0x19   :  { %5422 = shalt.err (!%p5419_p10)
}
  0x1a   :  { %s5423_s24 = scalar_lea.vmem %s23_s16, 28672  ;;  %p5428_p12 = scmp.lt.s32.totalorder %s23_s16, %s23_s16 }
  0x1b   :  { %p5424_p11 = scmp.ne.s32.totalorder %s23_s16, %s5423_s24  ;;  %p5429_p13 = scmp.lt.s32.totalorder %s5423_s24, %s5423_s24 }
  0x1d   :  { %p5430_p0 = por %p5429_p13, %p5428_p12 }
  0x1f   :  { %p5431_p1 = pnand %p5430_p0, %p5424_p11 }
  0x21   :  { %5434 = shalt.err (!%p5431_p1)
}
  0x22   :  { %s5489_s2 = smov 448   ;;  %s5490_s25 = smov 28  }
  0x23   :  { %28 = dma.hbm_to_vmem [thread:$0]  %s5774_s1, 28672, %s23_s16, [#allocation3], %s5489_s2, %s5489_s2, %s5490_s25  }
  0x24   :  { %s5491_s28 = smov [#allocation7]   ;;  %s5435_s9 = scalar_lea.hbm %s5776_s3, 6144 }
  0x25   :  { %s46_s29 = sshll.u32 %s5491_s28, 4  ;;  %p5436_p2 = scmp.ne.s32.totalorder %s5776_s3, %s5435_s9  ;;  %s47_s29 = int_to_ptr.vmem [resolvable:$true] %s46_s29 }
  0x26   :  { %p5439_p3 = scmp.lt.u32.totalorder %s5435_s9, %s5776_s3 }
  0x28   :  { %p5441_p4 = pnand %p5439_p3, %p5436_p2 }
  0x2a   :  { %5444 = shalt.err (!%p5441_p4)
}
  0x2b   :  { %s5445_s14 = scalar_lea.vmem %s47_s29, 6144  ;;  %p5450_p6 = scmp.lt.s32.totalorder %s47_s29, %s47_s29 }
  0x2c   :  { %p5446_p5 = scmp.ne.s32.totalorder %s47_s29, %s5445_s14  ;;  %p5451_p7 = scmp.lt.s32.totalorder %s5445_s14, %s5445_s14 }
  0x2e   :  { %p5452_p8 = por %p5451_p7, %p5450_p6 }
  0x30   :  { %p5453_p9 = pnand %p5452_p8, %p5446_p5 }
  0x32   :  { %5456 = shalt.err (!%p5453_p9)
}
  0x33   :  { %s5492_s1 = smov 128   ;;  %s5493_s15 = smov 8  }
  0x34   :  { %52 = dma.hbm_to_vmem [thread:$0]  %s5776_s3, 6144, %s47_s29, [#allocation6], %s5492_s1, %s5492_s1, %s5493_s15  }
  0x35   :  { %5479 = dma.done.wait [#allocation3], 28672  }
  0x36   :  { %5480 = vsyncadd [#allocation3], 4294938624 }
  0x37   :  { %5481 = dma.done.wait [#allocation6], 27648  }
  0x38   :  { %5482 = vsyncadd [#allocation6], 4294939648  ;;  %v4751_v0 = vld [vmem:[#allocation2 + $0x4] ss:$28 sps:$4 sm:$0xff]   ;;  %v4753_v1 = vld [vmem:[#allocation2 + $0xc] ss:$28 sps:$4 sm:$0xff]   ;;  %v328_v38 = vlaneseq }
  0x39   :  { %1544 = vmatprep.subr.bf16.mxu0 %v4751_v0  ;;  %v4755_v2 = vld [vmem:[#allocation2] ss:$28 sps:$4 sm:$0xff]   ;;  %v4756_v3 = vld [vmem:[#allocation2 + $0x8] ss:$28 sps:$4 sm:$0xff]   ;;  %1626 = vmatprep.subr.bf16.mxu1 %v4753_v1  ;;  %v4761_v6 = vld [vmem:[#allocation2 + $0x38] ss:$28 sps:$4 sm:$0xff]  }
  0x3a   :  { %v4757_v4 = vld [vmem:[#allocation2 + $0x3c] ss:$28 sps:$4 sm:$0xff]   ;;  %1545 = vmatpush1.bf16.msra.mxu0 %v4755_v2  ;;  %1627 = vmatpush1.bf16.msra.mxu1 %v4756_v3  ;;  %v4759_v5 = vld [vmem:[#allocation2 + $0x44] ss:$28 sps:$4 sm:$0xff]   ;;  %v4763_v8 = vld [vmem:[#allocation2 + $0x74] ss:$28 sps:$4 sm:$0xff]  }
  0x3b   :  { %1546 = vmatprep.subr.bf16.mxu0 %v4757_v4  ;;  %v4762_v7 = vld [vmem:[#allocation2 + $0x40] ss:$28 sps:$4 sm:$0xff]   ;;  %1628 = vmatprep.subr.bf16.mxu1 %v4759_v5  ;;  %v4767_v10 = vld [vmem:[#allocation2 + $0x70] ss:$28 sps:$4 sm:$0xff]   ;;  %v4768_v11 = vld [vmem:[#allocation2 + $0x78] ss:$28 sps:$4 sm:$0xff]  }
  0x3c   :  { %v4765_v9 = vld [vmem:[#allocation2 + $0x7c] ss:$28 sps:$4 sm:$0xff]   ;;  %v4769_v12 = vld [vmem:[#allocation2 + $0xac] ss:$28 sps:$4 sm:$0xff]   ;;  %v4771_v13 = vld [vmem:[#allocation2 + $0xb4] ss:$28 sps:$4 sm:$0xff]  }
  0x3d   :  { %v4773_v14 = vld [vmem:[#allocation2 + $0xa8] ss:$28 sps:$4 sm:$0xff]   ;;  %v4774_v15 = vld [vmem:[#allocation2 + $0xb0] ss:$28 sps:$4 sm:$0xff]   ;;  %v4779_v18 = vld [vmem:[#allocation2 + $0xe0] ss:$28 sps:$4 sm:$0xff]  }
  0x3e   :  { %1547 = vmatpush1.bf16.msra.mxu0 %v4761_v6  ;;  %1629 = vmatpush1.bf16.msra.mxu1 %v4762_v7  ;;  %v4775_v16 = vld [vmem:[#allocation2 + $0xe4] ss:$28 sps:$4 sm:$0xff]   ;;  %v4777_v17 = vld [vmem:[#allocation2 + $0xec] ss:$28 sps:$4 sm:$0xff]   ;;  %v4781_v20 = vld [vmem:[#allocation2 + $0x11c] ss:$28 sps:$4 sm:$0xff]  }
  0x3f   :  { %1548 = vmatprep.subr.bf16.mxu0 %v4763_v8  ;;  %1630 = vmatprep.subr.bf16.mxu1 %v4765_v9  ;;  %v4780_v19 = vld [vmem:[#allocation2 + $0xe8] ss:$28 sps:$4 sm:$0xff]   ;;  %v4785_v22 = vld [vmem:[#allocation2 + $0x118] ss:$28 sps:$4 sm:$0xff]   ;;  %v4786_v23 = vld [vmem:[#allocation2 + $0x120] ss:$28 sps:$4 sm:$0xff]  }
  0x40   :  { %v4783_v21 = vld [vmem:[#allocation2 + $0x124] ss:$28 sps:$4 sm:$0xff]   ;;  %v4787_v24 = vld [vmem:[#allocation2 + $0x154] ss:$28 sps:$4 sm:$0xff]   ;;  %v4789_v25 = vld [vmem:[#allocation2 + $0x15c] ss:$28 sps:$4 sm:$0xff]  }
  0x41   :  { %v4791_v26 = vld [vmem:[#allocation2 + $0x150] ss:$28 sps:$4 sm:$0xff]   ;;  %v4792_v27 = vld [vmem:[#allocation2 + $0x158] ss:$28 sps:$4 sm:$0xff]   ;;  %v4797_v30 = vld [vmem:[#allocation2 + $0x188] ss:$28 sps:$4 sm:$0xff]  }
  0x42   :  { %1549 = vmatpush1.bf16.msra.mxu0 %v4767_v10  ;;  %1631 = vmatpush1.bf16.msra.mxu1 %v4768_v11  ;;  %v4793_v28 = vld [vmem:[#allocation2 + $0x18c] ss:$28 sps:$4 sm:$0xff]   ;;  %v4795_v29 = vld [vmem:[#allocation2 + $0x194] ss:$28 sps:$4 sm:$0xff]   ;;  %v4799_v32 = vld [vmem:[#allocation2 + $0x1c4] ss:$28 sps:$4 sm:$0xff]  }
  0x43   :  { %1550 = vmatprep.subr.bf16.mxu0 %v4769_v12  ;;  %1632 = vmatprep.subr.bf16.mxu1 %v4771_v13  ;;  %v4798_v31 = vld [vmem:[#allocation2 + $0x190] ss:$28 sps:$4 sm:$0xff]   ;;  %v4803_v34 = vld [vmem:[#allocation2 + $0x1c0] ss:$28 sps:$4 sm:$0xff]   ;;  %v4804_v35 = vld [vmem:[#allocation2 + $0x1c8] ss:$28 sps:$4 sm:$0xff]  }
  0x44   :  { %v4801_v33 = vld [vmem:[#allocation2 + $0x1cc] ss:$28 sps:$4 sm:$0xff]   ;;  %v4805_v36 = vld [vmem:[#allocation2 + $0x1fc] ss:$28 sps:$4 sm:$0xff]   ;;  %v4807_v37 = vld [vmem:[#allocation2 + $0x204] ss:$28 sps:$4 sm:$0xff]  }
  0x45   :  { %v5494_v39 = vmov 1966171168   ;;  %v4809_v41 = vld [vmem:[#allocation2 + $0x1f8] ss:$28 sps:$4 sm:$0xff]   ;;  %v4810_v42 = vld [vmem:[#allocation2 + $0x200] ss:$28 sps:$4 sm:$0xff]  }
  0x46   :  { %1551 = vmatpush1.bf16.msra.mxu0 %v4773_v14  ;;  %1633 = vmatpush1.bf16.msra.mxu1 %v4774_v15  ;;  %v373_v40 = vunpack.c.l.s4 %v5494_v39  ;;  %v4811_v43 = vld [vmem:[#allocation2 + $0x234] ss:$28 sps:$4 sm:$0xff]   ;;  %v4813_v44 = vld [vmem:[#allocation2 + $0x23c] ss:$28 sps:$4 sm:$0xff]   ;;  %v5575_v45 = vshrl.u32 %v328_v38, 7  ;;  %vm5497_vm0 = vmmov 0  }
  0x47   :  { %1552 = vmatprep.subr.bf16.mxu0 %v4775_v16  ;;  %1634 = vmatprep.subr.bf16.mxu1 %v4777_v17  ;;  %v4815_v47 = vld [vmem:[#allocation2 + $0x230] ss:$28 sps:$4 sm:$0xff]   ;;  %v4816_v48 = vld [vmem:[#allocation2 + $0x238] ss:$28 sps:$4 sm:$0xff]   ;;  %v4821_v53 = vld [vmem:[#allocation2 + $0x268] ss:$28 sps:$4 sm:$0xff]  }
  0x48   :  { %v374_v46 = vunpack.c.0.s8 %v373_v40  ;;  %v4817_v49 = vld [vmem:[#allocation2 + $0x26c] ss:$28 sps:$4 sm:$0xff]   ;;  %v4819_v50 = vld [vmem:[#allocation2 + $0x274] ss:$28 sps:$4 sm:$0xff]   ;;  %v4823_v56 = vld [vmem:[#allocation2 + $0x2a4] ss:$28 sps:$4 sm:$0xff]  }
  0x49   :  { %v4042_v52 = vld.sshfl [vmem:[%s5773_s0] sm:$0x33 pattern:$0x75316420]  ;;  %v4822_v54 = vld [vmem:[#allocation2 + $0x270] ss:$28 sps:$4 sm:$0xff]  }
  0x4a   :  { %1553 = vmatpush1.bf16.msra.mxu0 %v4779_v18  ;;  %1635 = vmatpush1.bf16.msra.mxu1 %v4780_v19  ;;  %v377_v51 = vsub.s32 %v374_v46, %v5575_v45  ;;  %v371_v55 = vcombine.high %v4042_v52, %v4042_v52  ;;  %v4825_v57 = vld [vmem:[#allocation2 + $0x2ac] ss:$28 sps:$4 sm:$0xff]   ;;  %v4827_v59 = vld [vmem:[#allocation2 + $0x2a0] ss:$28 sps:$4 sm:$0xff]   ;;  %v4833_v63 = vld [vmem:[#allocation2 + $0x2d8] ss:$28 sps:$4 sm:$0xff]  }
  0x4b   :  { %1554 = vmatprep.subr.bf16.mxu0 %v4781_v20  ;;  %1636 = vmatprep.subr.bf16.mxu1 %v4783_v21  ;;  %v4828_v60 = vld [vmem:[#allocation2 + $0x2a8] ss:$28 sps:$4 sm:$0xff]   ;;  %v4829_v61 = vld [vmem:[#allocation2 + $0x2dc] ss:$28 sps:$4 sm:$0xff]   ;;  %v4835_v1 = vld [vmem:[#allocation2 + $0x314] ss:$28 sps:$4 sm:$0xff]  }
  0x4c   :  { %v5581_v58 = vrot.slane %v371_v55, %v377_v51  ;;  %v4831_v62 = vld [vmem:[#allocation2 + $0x2e4] ss:$28 sps:$4 sm:$0xff]   ;;  %v4837_v2 = vld [vmem:[#allocation2 + $0x31c] ss:$28 sps:$4 sm:$0xff]   ;;  %v4839_v3 = vld [vmem:[#allocation2 + $0x310] ss:$28 sps:$4 sm:$0xff]   ;;  %v5585_v12 = vrot.slane %v4042_v52, %v377_v51 }
  0x4d   :  { %v4834_v0 = vld [vmem:[#allocation2 + $0x2e0] ss:$28 sps:$4 sm:$0xff]   ;;  %v4840_v4 = vld [vmem:[#allocation2 + $0x318] ss:$28 sps:$4 sm:$0xff]   ;;  %v4841_v5 = vld [vmem:[#allocation2 + $0x34c] ss:$28 sps:$4 sm:$0xff]  }
  0x4e   :  { %1555 = vmatpush1.bf16.msra.mxu0 %v4785_v22  ;;  %1637 = vmatpush1.bf16.msra.mxu1 %v4786_v23  ;;  %v4843_v6 = vld [vmem:[#allocation2 + $0x354] ss:$28 sps:$4 sm:$0xff]   ;;  %v4845_v7 = vld [vmem:[#allocation2 + $0x348] ss:$28 sps:$4 sm:$0xff]   ;;  %v4847_v11 = vld [vmem:[#allocation2 + $0x380] ss:$28 sps:$4 sm:$0xff]   ;;  %v5589_v16 = vcombine.high %v5581_v58, %v5581_v58 }
  0x4f   :  { %1556 = vmatprep.subr.bf16.mxu0 %v4787_v24  ;;  %1638 = vmatprep.subr.bf16.mxu1 %v4789_v25  ;;  %v4846_v8 = vld [vmem:[#allocation2 + $0x350] ss:$28 sps:$4 sm:$0xff]   ;;  %v4849_v9 = vld [vmem:[#allocation2 + $0x384] ss:$28 sps:$4 sm:$0xff]   ;;  %v4855_v14 = vld [vmem:[#allocation2 + $0x3bc] ss:$28 sps:$4 sm:$0xff]  }
  0x50   :  { %1576 = vmatprep.mubr.bf16.mxu0 %v5581_v58  ;;  %1658 = vmatprep.mubr.bf16.mxu1 %v5581_v58  ;;  %v4852_v10 = vld [vmem:[#allocation2 + $0x38c] ss:$28 sps:$4 sm:$0xff]   ;;  %v4858_v15 = vld [vmem:[#allocation2 + $0x3c4] ss:$28 sps:$4 sm:$0xff]   ;;  %v4853_v17 = vld [vmem:[#allocation2 + $0x3b8] ss:$28 sps:$4 sm:$0xff]  }
  0x51   :  { %v4850_v13 = vld [vmem:[#allocation2 + $0x388] ss:$28 sps:$4 sm:$0xff]   ;;  %v4856_v18 = vld [vmem:[#allocation2 + $0x3c0] ss:$28 sps:$4 sm:$0xff]   ;;  %v4861_v19 = vld [vmem:[#allocation2 + $0x3f4] ss:$28 sps:$4 sm:$0xff]  }
  0x52   :  { %1557 = vmatpush1.bf16.msra.mxu0 %v4791_v26  ;;  %1639 = vmatpush1.bf16.msra.mxu1 %v4792_v27  ;;  %v4864_v20 = vld [vmem:[#allocation2 + $0x3fc] ss:$28 sps:$4 sm:$0xff]   ;;  %v4859_v21 = vld [vmem:[#allocation2 + $0x3f0] ss:$28 sps:$4 sm:$0xff]   ;;  %v4865_v25 = vld [vmem:[#allocation2 + $0x428] ss:$28 sps:$4 sm:$0xff]  }
  0x53   :  { %1558 = vmatprep.subr.bf16.mxu0 %v4793_v28  ;;  %1640 = vmatprep.subr.bf16.mxu1 %v4795_v29  ;;  %v4862_v22 = vld [vmem:[#allocation2 + $0x3f8] ss:$28 sps:$4 sm:$0xff]   ;;  %v4867_v23 = vld [vmem:[#allocation2 + $0x42c] ss:$28 sps:$4 sm:$0xff]   ;;  %v4873_v27 = vld [vmem:[#allocation2 + $0x464] ss:$28 sps:$4 sm:$0xff]  }
  0x54   :  { %v4870_v24 = vld [vmem:[#allocation2 + $0x434] ss:$28 sps:$4 sm:$0xff]   ;;  %v4876_v28 = vld [vmem:[#allocation2 + $0x46c] ss:$28 sps:$4 sm:$0xff]   ;;  %v4871_v29 = vld [vmem:[#allocation2 + $0x460] ss:$28 sps:$4 sm:$0xff]  }
  0x55   :  { %v4868_v26 = vld [vmem:[#allocation2 + $0x430] ss:$28 sps:$4 sm:$0xff]   ;;  %v4886_v38 = vld [vmem:[#allocation2 + $0x4d8] ss:$28 sps:$4 sm:$0xff]   ;;  %v4895_v46 = vld [vmem:[#allocation2 + $0x540] ss:$28 sps:$4 sm:$0xff]  }
  0x56   :  { %1559 = vmatpush1.bf16.msra.mxu0 %v4797_v30  ;;  %1641 = vmatpush1.bf16.msra.mxu1 %v4798_v31  ;;  %v4874_v30 = vld [vmem:[#allocation2 + $0x468] ss:$28 sps:$4 sm:$0xff]   ;;  %v4879_v31 = vld [vmem:[#allocation2 + $0x49c] ss:$28 sps:$4 sm:$0xff]   ;;  %v4894_v40 = vld [vmem:[#allocation2 + $0x514] ss:$28 sps:$4 sm:$0xff]  }
  0x57   :  { %1560 = vmatprep.subr.bf16.mxu0 %v4799_v32  ;;  %1642 = vmatprep.subr.bf16.mxu1 %v4801_v33  ;;  %v4882_v32 = vld [vmem:[#allocation2 + $0x4a4] ss:$28 sps:$4 sm:$0xff]   ;;  %v4877_v33 = vld [vmem:[#allocation2 + $0x498] ss:$28 sps:$4 sm:$0xff]   ;;  %v4891_v39 = vld [vmem:[#allocation2 + $0x50c] ss:$28 sps:$4 sm:$0xff]  }
  0x58   :  { %v4904_v51 = vld [vmem:[#allocation2 + $0x580] ss:$28 sps:$4 sm:$0xff]   ;;  %v4909_v52 = vld [vmem:[#allocation2 + $0x5b4] ss:$28 sps:$4 sm:$0xff]   ;;  %s5498_s21 = smov [#allocation8]  }
  0x59   :  { %v4910_v55 = vld [vmem:[#allocation2 + $0x5b8] ss:$28 sps:$4 sm:$0xff]  }
  0x5a   :  { %1561 = vmatpush1.bf16.msra.mxu0 %v4803_v34  ;;  %1643 = vmatpush1.bf16.msra.mxu1 %v4804_v35  ;;  %v4880_v34 = vld [vmem:[#allocation2 + $0x4a0] ss:$28 sps:$4 sm:$0xff]   ;;  %v4885_v35 = vld [vmem:[#allocation2 + $0x4d4] ss:$28 sps:$4 sm:$0xff]  }
  0x5b   :  { %1562 = vmatprep.subr.bf16.mxu0 %v4805_v36  ;;  %1644 = vmatprep.subr.bf16.mxu1 %v4807_v37  ;;  %v4888_v36 = vld [vmem:[#allocation2 + $0x4dc] ss:$28 sps:$4 sm:$0xff]   ;;  %v4883_v37 = vld [vmem:[#allocation2 + $0x4d0] ss:$28 sps:$4 sm:$0xff]  }
  0x5e   :  { %1563 = vmatpush1.bf16.msra.mxu0 %v4809_v41  ;;  %1645 = vmatpush1.bf16.msra.mxu1 %v4810_v42  ;;  %v4889_v41 = vld [vmem:[#allocation2 + $0x508] ss:$28 sps:$4 sm:$0xff]   ;;  %v4892_v42 = vld [vmem:[#allocation2 + $0x510] ss:$28 sps:$4 sm:$0xff]  }
  0x5f   :  { %1564 = vmatprep.subr.bf16.mxu0 %v4811_v43  ;;  %1646 = vmatprep.subr.bf16.mxu1 %v4813_v44  ;;  %v4897_v43 = vld [vmem:[#allocation2 + $0x544] ss:$28 sps:$4 sm:$0xff]   ;;  %v4900_v44 = vld [vmem:[#allocation2 + $0x54c] ss:$28 sps:$4 sm:$0xff]  }
  0x62   :  { %1565 = vmatpush1.bf16.msra.mxu0 %v4815_v47  ;;  %1647 = vmatpush1.bf16.msra.mxu1 %v4816_v48  ;;  %v4898_v47 = vld [vmem:[#allocation2 + $0x548] ss:$28 sps:$4 sm:$0xff]   ;;  %v4903_v48 = vld [vmem:[#allocation2 + $0x57c] ss:$28 sps:$4 sm:$0xff]  }
  0x63   :  { %1566 = vmatprep.subr.bf16.mxu0 %v4817_v49  ;;  %1648 = vmatprep.subr.bf16.mxu1 %v4819_v50  ;;  %v4906_v49 = vld [vmem:[#allocation2 + $0x584] ss:$28 sps:$4 sm:$0xff]   ;;  %v4901_v50 = vld [vmem:[#allocation2 + $0x578] ss:$28 sps:$4 sm:$0xff]  }
  0x66   :  { %1567 = vmatpush1.bf16.msra.mxu0 %v4821_v53  ;;  %1649 = vmatpush1.bf16.msra.mxu1 %v4822_v54  ;;  %v4912_v53 = vld [vmem:[#allocation2 + $0x5bc] ss:$28 sps:$4 sm:$0xff]   ;;  %v4907_v54 = vld [vmem:[#allocation2 + $0x5b0] ss:$28 sps:$4 sm:$0xff]  }
  0x67   :  { %1568 = vmatprep.subr.bf16.mxu0 %v4823_v56  ;;  %1650 = vmatprep.subr.bf16.mxu1 %v4825_v57  ;;  %v4915_v56 = vld [vmem:[#allocation2 + $0x5ec] ss:$28 sps:$4 sm:$0xff]   ;;  %v4918_v57 = vld [vmem:[#allocation2 + $0x5f4] ss:$28 sps:$4 sm:$0xff]  }
  0x6a   :  { %1569 = vmatpush1.bf16.msra.mxu0 %v4827_v59  ;;  %1651 = vmatpush1.bf16.msra.mxu1 %v4828_v60  ;;  %v4913_v59 = vld [vmem:[#allocation2 + $0x5e8] ss:$28 sps:$4 sm:$0xff]   ;;  %v4916_v60 = vld [vmem:[#allocation2 + $0x5f0] ss:$28 sps:$4 sm:$0xff]  }
  0x6b   :  { %1570 = vmatprep.subr.bf16.mxu0 %v4829_v61  ;;  %1652 = vmatprep.subr.bf16.mxu1 %v4831_v62  ;;  %v4921_v61 = vld [vmem:[#allocation2 + $0x624] ss:$28 sps:$4 sm:$0xff]   ;;  %v4924_v62 = vld [vmem:[#allocation2 + $0x62c] ss:$28 sps:$4 sm:$0xff]  }
  0x6e   :  { %1571 = vmatpush1.bf16.msra.mxu0 %v4833_v63  ;;  %1653 = vmatpush1.bf16.msra.mxu1 %v4834_v0  ;;  %v4919_v63 = vld [vmem:[#allocation2 + $0x620] ss:$28 sps:$4 sm:$0xff]   ;;  %v4922_v0 = vld [vmem:[#allocation2 + $0x628] ss:$28 sps:$4 sm:$0xff]  }
  0x6f   :  { %1572 = vmatprep.subr.bf16.mxu0 %v4835_v1  ;;  %1654 = vmatprep.subr.bf16.mxu1 %v4837_v2  ;;  %v4927_v1 = vld [vmem:[#allocation2 + $0x65c] ss:$28 sps:$4 sm:$0xff]   ;;  %v4930_v2 = vld [vmem:[#allocation2 + $0x664] ss:$28 sps:$4 sm:$0xff]  }
  0x72   :  { %1573 = vmatpush1.bf16.msra.mxu0 %v4839_v3  ;;  %1655 = vmatpush1.bf16.msra.mxu1 %v4840_v4  ;;  %v4925_v3 = vld [vmem:[#allocation2 + $0x658] ss:$28 sps:$4 sm:$0xff]   ;;  %v4928_v4 = vld [vmem:[#allocation2 + $0x660] ss:$28 sps:$4 sm:$0xff]  }
  0x73   :  { %1574 = vmatprep.subr.bf16.mxu0 %v4841_v5  ;;  %1656 = vmatprep.subr.bf16.mxu1 %v4843_v6  ;;  %v4933_v5 = vld [vmem:[#allocation2 + $0x694] ss:$28 sps:$4 sm:$0xff]   ;;  %v4936_v6 = vld [vmem:[#allocation2 + $0x69c] ss:$28 sps:$4 sm:$0xff]  }
  0x76   :  { %1575 = vmatpush1.bf16.msra.mxu0 %v4845_v7  ;;  %1657 = vmatpush1.bf16.msra.mxu1 %v4846_v8  ;;  %v4931_v7 = vld [vmem:[#allocation2 + $0x690] ss:$28 sps:$4 sm:$0xff]   ;;  %v4934_v8 = vld [vmem:[#allocation2 + $0x698] ss:$28 sps:$4 sm:$0xff]  }
  0x77   :  { %1585 = vmatprep.subr.bf16.mxu0 %v4849_v9  ;;  %1667 = vmatprep.subr.bf16.mxu1 %v4852_v10  ;;  %v4939_v9 = vld [vmem:[#allocation2 + $0x6cc] ss:$28 sps:$4 sm:$0xff]   ;;  %v4942_v10 = vld [vmem:[#allocation2 + $0x6d4] ss:$28 sps:$4 sm:$0xff]  }
  0x79   :  { %1577 = vmatmul.mubr.bf16.vlgmr.msra.gmra.mrb[0].mxu0 %v5585_v12  ;;  %1659 = vmatmul.mubr.bf16.vlgmr.msra.gmra.mrb[0].mxu1 %v5585_v12 }
  0x7a   :  { %1586 = vmatpush1.bf16.msra.mxu0 %v4847_v11  ;;  %1668 = vmatpush1.bf16.msra.mxu1 %v4850_v13  ;;  %v4937_v11 = vld [vmem:[#allocation2 + $0x6c8] ss:$28 sps:$4 sm:$0xff]   ;;  %v4940_v13 = vld [vmem:[#allocation2 + $0x6d0] ss:$28 sps:$4 sm:$0xff]  }
  0x7b   :  { %1587 = vmatprep.subr.bf16.mxu0 %v4855_v14  ;;  %1669 = vmatprep.subr.bf16.mxu1 %v4858_v15  ;;  %v4945_v14 = vld [vmem:[#allocation2 + $0x14] ss:$28 sps:$4 sm:$0xff]  }
  0x7c   :  { %1617 = vmatprep.mubr.bf16.mxu0 %v5589_v16  ;;  %1699 = vmatprep.mubr.bf16.mxu1 %v5589_v16  ;;  %v4991_v15 = vld [vmem:[#allocation2 + $0x1d8] ss:$28 sps:$4 sm:$0xff]  }
  0x7e   :  { %1588 = vmatpush1.bf16.msra.mxu0 %v4853_v17  ;;  %1670 = vmatpush1.bf16.msra.mxu1 %v4856_v18  ;;  %v5597_v17 = vcombine.high %v5585_v12, %v5585_v12  ;;  %v4943_v18 = vld [vmem:[#allocation2 + $0x10] ss:$28 sps:$4 sm:$0xff]  }
  0x7f   :  { %1589 = vmatprep.subr.bf16.mxu0 %v4861_v19  ;;  %1671 = vmatprep.subr.bf16.mxu1 %v4864_v20  ;;  %v4992_v19 = vld [vmem:[#allocation2 + $0x18] ss:$28 sps:$4 sm:$0xff]   ;;  %v4948_v20 = vld [vmem:[#allocation2 + $0x4c] ss:$28 sps:$4 sm:$0xff]  }
  0x82   :  { %1590 = vmatpush1.bf16.msra.mxu0 %v4859_v21  ;;  %1672 = vmatpush1.bf16.msra.mxu1 %v4862_v22  ;;  %v4996_v21 = vld [vmem:[#allocation2 + $0x210] ss:$28 sps:$4 sm:$0xff]   ;;  %v4946_v22 = vld [vmem:[#allocation2 + $0x48] ss:$28 sps:$4 sm:$0xff]  }
  0x83   :  { %1591 = vmatprep.subr.bf16.mxu0 %v4867_v23  ;;  %1673 = vmatprep.subr.bf16.mxu1 %v4870_v24  ;;  %v4997_v23 = vld [vmem:[#allocation2 + $0x50] ss:$28 sps:$4 sm:$0xff]   ;;  %v4951_v24 = vld [vmem:[#allocation2 + $0x84] ss:$28 sps:$4 sm:$0xff]  }
  0x86   :  { %1592 = vmatpush1.bf16.msra.mxu0 %v4865_v25  ;;  %1674 = vmatpush1.bf16.msra.mxu1 %v4868_v26  ;;  %v5001_v25 = vld [vmem:[#allocation2 + $0x248] ss:$28 sps:$4 sm:$0xff]   ;;  %v4949_v26 = vld [vmem:[#allocation2 + $0x80] ss:$28 sps:$4 sm:$0xff]  }
  0x87   :  { %1593 = vmatprep.subr.bf16.mxu0 %v4873_v27  ;;  %1675 = vmatprep.subr.bf16.mxu1 %v4876_v28  ;;  %v4954_v27 = vld [vmem:[#allocation2 + $0xbc] ss:$28 sps:$4 sm:$0xff]   ;;  %v5002_v28 = vld [vmem:[#allocation2 + $0x88] ss:$28 sps:$4 sm:$0xff]  }
  0x8a   :  { %1594 = vmatpush1.bf16.msra.mxu0 %v4871_v29  ;;  %1676 = vmatpush1.bf16.msra.mxu1 %v4874_v30  ;;  %v5006_v29 = vld [vmem:[#allocation2 + $0x280] ss:$28 sps:$4 sm:$0xff]   ;;  %v4952_v30 = vld [vmem:[#allocation2 + $0xb8] ss:$28 sps:$4 sm:$0xff]  }
  0x8b   :  { %1595 = vmatprep.subr.bf16.mxu0 %v4879_v31  ;;  %1677 = vmatprep.subr.bf16.mxu1 %v4882_v32  ;;  %v4957_v31 = vld [vmem:[#allocation2 + $0xf4] ss:$28 sps:$4 sm:$0xff]   ;;  %v5007_v32 = vld [vmem:[#allocation2 + $0xc0] ss:$28 sps:$4 sm:$0xff]  }
  0x8e   :  { %1596 = vmatpush1.bf16.msra.mxu0 %v4877_v33  ;;  %1678 = vmatpush1.bf16.msra.mxu1 %v4880_v34  ;;  %v5011_v33 = vld [vmem:[#allocation2 + $0x2b8] ss:$28 sps:$4 sm:$0xff]   ;;  %v4955_v34 = vld [vmem:[#allocation2 + $0xf0] ss:$28 sps:$4 sm:$0xff]  }
  0x8f   :  { %1597 = vmatprep.subr.bf16.mxu0 %v4885_v35  ;;  %1679 = vmatprep.subr.bf16.mxu1 %v4888_v36  ;;  %v4960_v35 = vld [vmem:[#allocation2 + $0x12c] ss:$28 sps:$4 sm:$0xff]  }
  0x90   :  { %v5016_v36 = vld [vmem:[#allocation2 + $0x2f0] ss:$28 sps:$4 sm:$0xff]  }
  0x92   :  { %1598 = vmatpush1.bf16.msra.mxu0 %v4883_v37  ;;  %1680 = vmatpush1.bf16.msra.mxu1 %v4886_v38  ;;  %v4958_v37 = vld [vmem:[#allocation2 + $0x128] ss:$28 sps:$4 sm:$0xff]  }
  0x93   :  { %1599 = vmatprep.subr.bf16.mxu0 %v4891_v39  ;;  %1681 = vmatprep.subr.bf16.mxu1 %v4894_v40  ;;  %v4963_v38 = vld [vmem:[#allocation2 + $0x164] ss:$28 sps:$4 sm:$0xff]   ;;  %v5017_v39 = vld [vmem:[#allocation2 + $0x130] ss:$28 sps:$4 sm:$0xff]  }
  0x94   :  { %v5021_v40 = vld [vmem:[#allocation2 + $0x328] ss:$28 sps:$4 sm:$0xff]  }
  0x96   :  { %1600 = vmatpush1.bf16.msra.mxu0 %v4889_v41  ;;  %1682 = vmatpush1.bf16.msra.mxu1 %v4892_v42  ;;  %v4961_v41 = vld [vmem:[#allocation2 + $0x160] ss:$28 sps:$4 sm:$0xff]   ;;  %v5022_v42 = vld [vmem:[#allocation2 + $0x168] ss:$28 sps:$4 sm:$0xff]  }
  0x97   :  { %1601 = vmatprep.subr.bf16.mxu0 %v4897_v43  ;;  %1683 = vmatprep.subr.bf16.mxu1 %v4900_v44  ;;  %v4966_v43 = vld [vmem:[#allocation2 + $0x19c] ss:$28 sps:$4 sm:$0xff]  }
  0x98   :  { %v5026_v44 = vld [vmem:[#allocation2 + $0x360] ss:$28 sps:$4 sm:$0xff]  }
  0x9a   :  { %1602 = vmatpush1.bf16.msra.mxu0 %v4895_v46  ;;  %1684 = vmatpush1.bf16.msra.mxu1 %v4898_v47  ;;  %v4964_v46 = vld [vmem:[#allocation2 + $0x198] ss:$28 sps:$4 sm:$0xff]  }
  0x9b   :  { %1603 = vmatprep.subr.bf16.mxu0 %v4903_v48  ;;  %1685 = vmatprep.subr.bf16.mxu1 %v4906_v49  ;;  %v4969_v47 = vld [vmem:[#allocation2 + $0x1d4] ss:$28 sps:$4 sm:$0xff]   ;;  %v5027_v48 = vld [vmem:[#allocation2 + $0x1a0] ss:$28 sps:$4 sm:$0xff]  }
  0x9c   :  { %v5031_v49 = vld [vmem:[#allocation2 + $0x558] ss:$28 sps:$4 sm:$0xff]  }
  0x9e   :  { %1604 = vmatpush1.bf16.msra.mxu0 %v4901_v50  ;;  %1686 = vmatpush1.bf16.msra.mxu1 %v4904_v51  ;;  %v4967_v50 = vld [vmem:[#allocation2 + $0x1d0] ss:$28 sps:$4 sm:$0xff]   ;;  %v5032_v51 = vld [vmem:[#allocation2 + $0x398] ss:$28 sps:$4 sm:$0xff]  }
  0x9f   :  { %1605 = vmatprep.subr.bf16.mxu0 %v4909_v52  ;;  %1687 = vmatprep.subr.bf16.mxu1 %v4912_v53  ;;  %v4972_v52 = vld [vmem:[#allocation2 + $0x20c] ss:$28 sps:$4 sm:$0xff]  }
  0xa0   :  { %v5036_v53 = vld [vmem:[#allocation2 + $0x590] ss:$28 sps:$4 sm:$0xff]  }
  0xa2   :  { %1606 = vmatpush1.bf16.msra.mxu0 %v4907_v54  ;;  %1688 = vmatpush1.bf16.msra.mxu1 %v4910_v55  ;;  %v4970_v54 = vld [vmem:[#allocation2 + $0x208] ss:$28 sps:$4 sm:$0xff]   ;;  %v5037_v55 = vld [vmem:[#allocation2 + $0x3d0] ss:$28 sps:$4 sm:$0xff]  }
  0xa3   :  { %1607 = vmatprep.subr.bf16.mxu0 %v4915_v56  ;;  %1689 = vmatprep.subr.bf16.mxu1 %v4918_v57  ;;  %v4975_v56 = vld [vmem:[#allocation2 + $0x244] ss:$28 sps:$4 sm:$0xff]  }
  0xa4   :  { %v5041_v57 = vld [vmem:[#allocation2 + $0x5c8] ss:$28 sps:$4 sm:$0xff]  }
  0xa6   :  { %1608 = vmatpush1.bf16.msra.mxu0 %v4913_v59  ;;  %1690 = vmatpush1.bf16.msra.mxu1 %v4916_v60  ;;  %v4973_v59 = vld [vmem:[#allocation2 + $0x240] ss:$28 sps:$4 sm:$0xff]   ;;  %v5042_v60 = vld [vmem:[#allocation2 + $0x408] ss:$28 sps:$4 sm:$0xff]  }
  0xa7   :  { %1609 = vmatprep.subr.bf16.mxu0 %v4921_v61  ;;  %1691 = vmatprep.subr.bf16.mxu1 %v4924_v62  ;;  %v4978_v61 = vld [vmem:[#allocation2 + $0x27c] ss:$28 sps:$4 sm:$0xff]  }
  0xa8   :  { %v5046_v62 = vld [vmem:[#allocation2 + $0x600] ss:$28 sps:$4 sm:$0xff]  }
  0xaa   :  { %1610 = vmatpush1.bf16.msra.mxu0 %v4919_v63  ;;  %1692 = vmatpush1.bf16.msra.mxu1 %v4922_v0  ;;  %v4976_v63 = vld [vmem:[#allocation2 + $0x278] ss:$28 sps:$4 sm:$0xff]  }
  0xab   :  { %1611 = vmatprep.subr.bf16.mxu0 %v4927_v1  ;;  %1693 = vmatprep.subr.bf16.mxu1 %v4930_v2  ;;  %v4981_v0 = vld [vmem:[#allocation2 + $0x2b4] ss:$28 sps:$4 sm:$0xff]   ;;  %v5047_v1 = vld [vmem:[#allocation2 + $0x440] ss:$28 sps:$4 sm:$0xff]  }
  0xac   :  { %v5051_v2 = vld [vmem:[#allocation2 + $0x638] ss:$28 sps:$4 sm:$0xff]  }
  0xae   :  { %1612 = vmatpush1.bf16.msra.mxu0 %v4925_v3  ;;  %1694 = vmatpush1.bf16.msra.mxu1 %v4928_v4  ;;  %v4979_v3 = vld [vmem:[#allocation2 + $0x2b0] ss:$28 sps:$4 sm:$0xff]  }
  0xaf   :  { %1613 = vmatprep.subr.bf16.mxu0 %v4933_v5  ;;  %1695 = vmatprep.subr.bf16.mxu1 %v4936_v6  ;;  %v4984_v4 = vld [vmem:[#allocation2 + $0x2ec] ss:$28 sps:$4 sm:$0xff]   ;;  %v5052_v5 = vld [vmem:[#allocation2 + $0x478] ss:$28 sps:$4 sm:$0xff]  }
  0xb0   :  { %v5056_v6 = vld [vmem:[#allocation2 + $0x670] ss:$28 sps:$4 sm:$0xff]  }
  0xb2   :  { %1614 = vmatpush1.bf16.msra.mxu0 %v4931_v7  ;;  %1696 = vmatpush1.bf16.msra.mxu1 %v4934_v8  ;;  %v4982_v7 = vld [vmem:[#allocation2 + $0x2e8] ss:$28 sps:$4 sm:$0xff]  }
  0xb3   :  { %1615 = vmatprep.subr.bf16.mxu0 %v4939_v9  ;;  %1697 = vmatprep.subr.bf16.mxu1 %v4942_v10  ;;  %v4987_v8 = vld [vmem:[#allocation2 + $0x324] ss:$28 sps:$4 sm:$0xff]   ;;  %v5057_v9 = vld [vmem:[#allocation2 + $0x4b0] ss:$28 sps:$4 sm:$0xff]  }
  0xb4   :  { %v5061_v10 = vld [vmem:[#allocation2 + $0x6a8] ss:$28 sps:$4 sm:$0xff]  }
  0xb6   :  { %1616 = vmatpush1.bf16.msra.mxu0 %v4937_v11  ;;  %1698 = vmatpush1.bf16.msra.mxu1 %v4940_v13  ;;  %v4985_v11 = vld [vmem:[#allocation2 + $0x320] ss:$28 sps:$4 sm:$0xff]   ;;  %v5062_v13 = vld [vmem:[#allocation2 + $0x4e8] ss:$28 sps:$4 sm:$0xff]  }
  0xb7   :  { %1708 = vmatprep.subr.bf16.mxu0 %v4945_v14  ;;  %4509 = vmatprep.subr.bf16.mxu1 %v4991_v15  ;;  %v4990_v14 = vld [vmem:[#allocation2 + $0x35c] ss:$28 sps:$4 sm:$0xff]  }
  0xb8   :  { %v5066_v15 = vld [vmem:[#allocation2 + $0x6e0] ss:$28 sps:$4 sm:$0xff]  }
  0xb9   :  { %1618 = vmatmul.mubr.bf16.vlgmr.msra.gmra.mrb[0].mxu0 %v5597_v17  ;;  %1700 = vmatmul.mubr.bf16.vlgmr.msra.gmra.mrb[0].mxu1 %v5597_v17 }
  0xba   :  { %1709 = vmatpush1.bf16.msra.mxu0 %v4943_v18  ;;  %4510 = vmatpush3.bf16.msra.mxu1 %v4992_v19  ;;  %v4988_v18 = vld [vmem:[#allocation2 + $0x358] ss:$28 sps:$4 sm:$0xff]  }
  0xbb   :  { %1710 = vmatprep.subr.bf16.mxu0 %v4948_v20  ;;  %1740 = vmatprep.mubr.bf16.mxu0 %v5581_v58  ;;  %v4995_v19 = vld [vmem:[#allocation2 + $0x394] ss:$28 sps:$4 sm:$0xff]   ;;  %v5067_v20 = vld [vmem:[#allocation2 + $0x520] ss:$28 sps:$4 sm:$0xff]  }
  0xbc   :  { %4511 = vmatprep.subr.bf16.mxu1 %v4996_v21  ;;  %1822 = vmatprep.mubr.bf16.mxu1 %v5581_v58  ;;  %v5012_v58 = vld [vmem:[#allocation2 + $0xf8] ss:$28 sps:$4 sm:$0xff]   ;;  %v5073_v21 = vld [vmem:[#allocation5 + $0x4] ss:$12 sps:$4 sm:$0xff]  }
  0xbe   :  { %1711 = vmatpush1.bf16.msra.mxu0 %v4946_v22  ;;  %4512 = vmatpush3.bf16.msra.mxu1 %v4997_v23  ;;  %v4993_v22 = vld [vmem:[#allocation2 + $0x390] ss:$28 sps:$4 sm:$0xff]  }
  0xbf   :  { %1712 = vmatprep.subr.bf16.mxu0 %v4951_v24  ;;  %4513 = vmatprep.subr.bf16.mxu1 %v5001_v25  ;;  %v5000_v23 = vld [vmem:[#allocation2 + $0x3cc] ss:$28 sps:$4 sm:$0xff]  }
  0xc0   :  { %v5071_v24 = vld [vmem:[#allocation5] ss:$12 sps:$4 sm:$0xff]   ;;  %v5076_v25 = vld [vmem:[#allocation5 + $0x1c] ss:$12 sps:$4 sm:$0xff]  }
  0xc2   :  { %1713 = vmatpush1.bf16.msra.mxu0 %v4949_v26  ;;  %4514 = vmatpush3.bf16.msra.mxu1 %v5002_v28  ;;  %v4998_v26 = vld [vmem:[#allocation2 + $0x3c8] ss:$28 sps:$4 sm:$0xff]  }
  0xc3   :  { %1714 = vmatprep.subr.bf16.mxu0 %v4954_v27  ;;  %4515 = vmatprep.subr.bf16.mxu1 %v5006_v29  ;;  %v5005_v27 = vld [vmem:[#allocation2 + $0x404] ss:$28 sps:$4 sm:$0xff]  }
  0xc4   :  { %v5074_v28 = vld [vmem:[#allocation5 + $0x18] ss:$12 sps:$4 sm:$0xff]   ;;  %v5079_v29 = vld [vmem:[#allocation5 + $0x34] ss:$12 sps:$4 sm:$0xff]  }
  0xc6   :  { %1715 = vmatpush1.bf16.msra.mxu0 %v4952_v30  ;;  %4516 = vmatpush3.bf16.msra.mxu1 %v5007_v32  ;;  %v5003_v30 = vld [vmem:[#allocation2 + $0x400] ss:$28 sps:$4 sm:$0xff]  }
  0xc7   :  { %1716 = vmatprep.subr.bf16.mxu0 %v4957_v31  ;;  %4517 = vmatprep.subr.bf16.mxu1 %v5011_v33  ;;  %v5010_v31 = vld [vmem:[#allocation2 + $0x43c] ss:$28 sps:$4 sm:$0xff]  }
  0xc8   :  { %v5077_v32 = vld [vmem:[#allocation5 + $0x30] ss:$12 sps:$4 sm:$0xff]   ;;  %v5082_v33 = vld [vmem:[#allocation5 + $0x4c] ss:$12 sps:$4 sm:$0xff]  }
  0xca   :  { %1717 = vmatpush1.bf16.msra.mxu0 %v4955_v34  ;;  %4518 = vmatpush3.bf16.msra.mxu1 %v5012_v58  ;;  %v5008_v34 = vld [vmem:[#allocation2 + $0x438] ss:$28 sps:$4 sm:$0xff]   ;;  %v5085_v58 = vld [vmem:[#allocation5 + $0x64] ss:$12 sps:$4 sm:$0xff]  }
  0xcb   :  { %1718 = vmatprep.subr.bf16.mxu0 %v4960_v35  ;;  %4519 = vmatprep.subr.bf16.mxu1 %v5016_v36  ;;  %v5080_v35 = vld [vmem:[#allocation5 + $0x48] ss:$12 sps:$4 sm:$0xff]  }
  0xcc   :  { %v5020_v36 = vld [vmem:[#allocation2 + $0x4ac] ss:$28 sps:$4 sm:$0xff]  }
  0xce   :  { %1719 = vmatpush1.bf16.msra.mxu0 %v4958_v37  ;;  %4520 = vmatpush3.bf16.msra.mxu1 %v5017_v39  ;;  %v5083_v37 = vld [vmem:[#allocation5 + $0x60] ss:$12 sps:$4 sm:$0xff]   ;;  %v5018_v39 = vld [vmem:[#allocation2 + $0x4a8] ss:$28 sps:$4 sm:$0xff]  }
  0xcf   :  { %1720 = vmatprep.subr.bf16.mxu0 %v4963_v38  ;;  %4521 = vmatprep.subr.bf16.mxu1 %v5021_v40  ;;  %v5088_v38 = vld [vmem:[#allocation5 + $0x7c] ss:$12 sps:$4 sm:$0xff]   ;;  %v5025_v40 = vld [vmem:[#allocation2 + $0x4e4] ss:$28 sps:$4 sm:$0xff]  }
  0xd2   :  { %1721 = vmatpush1.bf16.msra.mxu0 %v4961_v41  ;;  %4522 = vmatpush3.bf16.msra.mxu1 %v5022_v42  ;;  %v5086_v41 = vld [vmem:[#allocation5 + $0x78] ss:$12 sps:$4 sm:$0xff]   ;;  %v5091_v42 = vld [vmem:[#allocation5 + $0x94] ss:$12 sps:$4 sm:$0xff]  }
  0xd3   :  { %1722 = vmatprep.subr.bf16.mxu0 %v4966_v43  ;;  %4523 = vmatprep.subr.bf16.mxu1 %v5026_v44  ;;  %v5023_v43 = vld [vmem:[#allocation2 + $0x4e0] ss:$28 sps:$4 sm:$0xff]  }
  0xd4   :  { %v5030_v44 = vld [vmem:[#allocation2 + $0x51c] ss:$28 sps:$4 sm:$0xff]  }
  0xd6   :  { %1723 = vmatpush1.bf16.msra.mxu0 %v4964_v46  ;;  %4524 = vmatpush3.bf16.msra.mxu1 %v5027_v48  ;;  %v5089_v46 = vld [vmem:[#allocation5 + $0x90] ss:$12 sps:$4 sm:$0xff]   ;;  %v5028_v48 = vld [vmem:[#allocation2 + $0x518] ss:$28 sps:$4 sm:$0xff]  }
  0xd7   :  { %1724 = vmatprep.subr.bf16.mxu0 %v4969_v47  ;;  %4531 = vmatprep.subr.bf16.mxu1 %v5031_v49  ;;  %v5094_v47 = vld [vmem:[#allocation5 + $0xac] ss:$12 sps:$4 sm:$0xff]   ;;  %v5035_v49 = vld [vmem:[#allocation2 + $0x554] ss:$28 sps:$4 sm:$0xff]  }
  0xd9   :  { %1823 = vmatmul.mubr.bf16.vlgmr.msra.gmra.mrb[4].mxu1 %v5585_v12 }
  0xda   :  { %1725 = vmatpush1.bf16.msra.mxu0 %v4967_v50  ;;  %4532 = vmatpush3.bf16.msra.mxu1 %v5032_v51  ;;  %v5092_v50 = vld [vmem:[#allocation5 + $0xa8] ss:$12 sps:$4 sm:$0xff]   ;;  %v5033_v51 = vld [vmem:[#allocation2 + $0x550] ss:$28 sps:$4 sm:$0xff]  }
  0xdb   :  { %1726 = vmatprep.subr.bf16.mxu0 %v4972_v52  ;;  %4533 = vmatprep.subr.bf16.mxu1 %v5036_v53  ;;  %v5097_v52 = vld [vmem:[#allocation5 + $0xc4] ss:$12 sps:$4 sm:$0xff]   ;;  %v5040_v53 = vld [vmem:[#allocation2 + $0x58c] ss:$28 sps:$4 sm:$0xff]  }
  0xdc   :  { %1862 = vmatprep.mubr.bf16.mxu1 %v5589_v16 }
  0xde   :  { %1727 = vmatpush1.bf16.msra.mxu0 %v4970_v54  ;;  %4534 = vmatpush3.bf16.msra.mxu1 %v5037_v55  ;;  %v5095_v54 = vld [vmem:[#allocation5 + $0xc0] ss:$12 sps:$4 sm:$0xff]   ;;  %v5102_v55 = vld [vmem:[#allocation5 + $0xdc] ss:$12 sps:$4 sm:$0xff]  }
  0xdf   :  { %1728 = vmatprep.subr.bf16.mxu0 %v4975_v56  ;;  %4535 = vmatprep.subr.bf16.mxu1 %v5041_v57  ;;  %v5038_v56 = vld [vmem:[#allocation2 + $0x588] ss:$28 sps:$4 sm:$0xff]  }
  0xe0   :  { %v5045_v57 = vld [vmem:[#allocation2 + $0x5c4] ss:$28 sps:$4 sm:$0xff]  }
  0xe2   :  { %1729 = vmatpush1.bf16.msra.mxu0 %v4973_v59  ;;  %4536 = vmatpush3.bf16.msra.mxu1 %v5042_v60  ;;  %v5100_v59 = vld [vmem:[#allocation5 + $0xd8] ss:$12 sps:$4 sm:$0xff]   ;;  %v5107_v60 = vld [vmem:[#allocation5 + $0xf4] ss:$12 sps:$4 sm:$0xff]  }
  0xe3   :  { %1730 = vmatprep.subr.bf16.mxu0 %v4978_v61  ;;  %4537 = vmatprep.subr.bf16.mxu1 %v5046_v62  ;;  %v5043_v61 = vld [vmem:[#allocation2 + $0x5c0] ss:$28 sps:$4 sm:$0xff]  }
  0xe4   :  { %v5050_v62 = vld [vmem:[#allocation2 + $0x5fc] ss:$28 sps:$4 sm:$0xff]  }
  0xe6   :  { %1731 = vmatpush1.bf16.msra.mxu0 %v4976_v63  ;;  %4538 = vmatpush3.bf16.msra.mxu1 %v5047_v1  ;;  %v5105_v63 = vld [vmem:[#allocation5 + $0xf0] ss:$12 sps:$4 sm:$0xff]   ;;  %v5048_v1 = vld [vmem:[#allocation2 + $0x5f8] ss:$28 sps:$4 sm:$0xff]  }
  0xe7   :  { %1732 = vmatprep.subr.bf16.mxu0 %v4981_v0  ;;  %4539 = vmatprep.subr.bf16.mxu1 %v5051_v2  ;;  %v5112_v0 = vld [vmem:[#allocation5 + $0x10c] ss:$12 sps:$4 sm:$0xff]   ;;  %v5055_v2 = vld [vmem:[#allocation2 + $0x634] ss:$28 sps:$4 sm:$0xff]  }
  0xea   :  { %1733 = vmatpush1.bf16.msra.mxu0 %v4979_v3  ;;  %4540 = vmatpush3.bf16.msra.mxu1 %v5052_v5  ;;  %v5110_v3 = vld [vmem:[#allocation5 + $0x108] ss:$12 sps:$4 sm:$0xff]   ;;  %v5053_v5 = vld [vmem:[#allocation2 + $0x630] ss:$28 sps:$4 sm:$0xff]  }
  0xeb   :  { %1734 = vmatprep.subr.bf16.mxu0 %v4984_v4  ;;  %4541 = vmatprep.subr.bf16.mxu1 %v5056_v6  ;;  %v5117_v4 = vld [vmem:[#allocation5 + $0x124] ss:$12 sps:$4 sm:$0xff]   ;;  %v5060_v6 = vld [vmem:[#allocation2 + $0x66c] ss:$28 sps:$4 sm:$0xff]  }
  0xee   :  { %1735 = vmatpush1.bf16.msra.mxu0 %v4982_v7  ;;  %4542 = vmatpush3.bf16.msra.mxu1 %v5057_v9  ;;  %v5115_v7 = vld [vmem:[#allocation5 + $0x120] ss:$12 sps:$4 sm:$0xff]   ;;  %v5058_v9 = vld [vmem:[#allocation2 + $0x668] ss:$28 sps:$4 sm:$0xff]  }
  0xef   :  { %1736 = vmatprep.subr.bf16.mxu0 %v4987_v8  ;;  %4543 = vmatprep.subr.bf16.mxu1 %v5061_v10  ;;  %v5122_v8 = vld [vmem:[#allocation5 + $0x13c] ss:$12 sps:$4 sm:$0xff]   ;;  %v5065_v10 = vld [vmem:[#allocation2 + $0x6a4] ss:$28 sps:$4 sm:$0xff]  }
  0xf2   :  { %1737 = vmatpush1.bf16.msra.mxu0 %v4985_v11  ;;  %4544 = vmatpush3.bf16.msra.mxu1 %v5062_v13  ;;  %v5120_v11 = vld [vmem:[#allocation5 + $0x138] ss:$12 sps:$4 sm:$0xff]   ;;  %v5127_v13 = vld [vmem:[#allocation5 + $0x154] ss:$12 sps:$4 sm:$0xff]  }
  0xf3   :  { %1738 = vmatprep.subr.bf16.mxu0 %v4990_v14  ;;  %4545 = vmatprep.subr.bf16.mxu1 %v5066_v15  ;;  %v5063_v14 = vld [vmem:[#allocation2 + $0x6a0] ss:$28 sps:$4 sm:$0xff]  }
  0xf4   :  { %v5070_v15 = vld [vmem:[#allocation2 + $0x6dc] ss:$28 sps:$4 sm:$0xff]  }
  0xf6   :  { %1739 = vmatpush1.bf16.msra.mxu0 %v4988_v18  ;;  %4546 = vmatpush3.bf16.msra.mxu1 %v5067_v20  ;;  %v5125_v18 = vld [vmem:[#allocation5 + $0x150] ss:$12 sps:$4 sm:$0xff]   ;;  %v5132_v20 = vld [vmem:[#allocation5 + $0x16c] ss:$12 sps:$4 sm:$0xff]  }
  0xf7   :  { %1749 = vmatprep.subr.bf16.mxu0 %v4995_v19  ;;  %3021 = vmatprep.subr.bf16.mxu1 %v5073_v21  ;;  %v5068_v19 = vld [vmem:[#allocation2 + $0x6d8] ss:$28 sps:$4 sm:$0xff]  }
  0xf8   :  { %v5098_v21 = vld [vmem:[#allocation5 + $0xc8] ss:$12 sps:$4 sm:$0xff]  }
  0xf9   :  { %1741 = vmatmul.mubr.bf16.vlgmr.msra.gmra.mrb[4].mxu0 %v5585_v12  ;;  %1863 = vmatmul.mubr.bf16.vlgmr.msra.gmra.mrb[8].mxu1 %v5597_v17  ;;  %v5015_v12 = vld [vmem:[#allocation2 + $0x474] ss:$28 sps:$4 sm:$0xff]  }
  0xfa   :  { %1750 = vmatpush1.bf16.msra.mxu0 %v4993_v22  ;;  %1781 = vmatprep.mubr.bf16.mxu0 %v5589_v16  ;;  %v5013_v16 = vld [vmem:[#allocation2 + $0x470] ss:$28 sps:$4 sm:$0xff]   ;;  %v5130_v22 = vld [vmem:[#allocation5 + $0x168] ss:$12 sps:$4 sm:$0xff]  }
  0xfb   :  { %1751 = vmatprep.subr.bf16.mxu0 %v5000_v23  ;;  %3022 = vmatpush1.bf16.msra.mxu1 %v5071_v24  ;;  %v5137_v23 = vld [vmem:[#allocation5 + $0x184] ss:$12 sps:$4 sm:$0xff]   ;;  %v5099_v24 = vld [vmem:[#allocation5 + $0x8] ss:$12 sps:$4 sm:$0xff]  }
  0xfc   :  { %3023 = vmatprep.subr.bf16.mxu1 %v5076_v25  ;;  %v5103_v25 = vld [vmem:[#allocation5 + $0xe0] ss:$12 sps:$4 sm:$0xff]  }
  0xfe   :  { %1752 = vmatpush1.bf16.msra.mxu0 %v4998_v26  ;;  %v5104_v26 = vld [vmem:[#allocation5 + $0x20] ss:$12 sps:$4 sm:$0xff]  }
  0xff   :  { %1753 = vmatprep.subr.bf16.mxu0 %v5005_v27  ;;  %3024 = vmatpush1.bf16.msra.mxu1 %v5074_v28  ;;  %v5108_v27 = vld [vmem:[#allocation5 + $0xf8] ss:$12 sps:$4 sm:$0xff]  }
 0x100   :  { %3025 = vmatprep.subr.bf16.mxu1 %v5079_v29  ;;  %v5109_v28 = vld [vmem:[#allocation5 + $0x38] ss:$12 sps:$4 sm:$0xff]   ;;  %v5113_v29 = vld [vmem:[#allocation5 + $0x110] ss:$12 sps:$4 sm:$0xff]  }
 0x102   :  { %1754 = vmatpush1.bf16.msra.mxu0 %v5003_v30  ;;  %v5114_v30 = vld [vmem:[#allocation5 + $0x50] ss:$12 sps:$4 sm:$0xff]  }
 0x103   :  { %1755 = vmatprep.subr.bf16.mxu0 %v5010_v31  ;;  %3026 = vmatpush1.bf16.msra.mxu1 %v5077_v32  ;;  %v5118_v31 = vld [vmem:[#allocation5 + $0x128] ss:$12 sps:$4 sm:$0xff]  }
 0x104   :  { %3027 = vmatprep.subr.bf16.mxu1 %v5082_v33  ;;  %v5119_v32 = vld [vmem:[#allocation5 + $0x68] ss:$12 sps:$4 sm:$0xff]   ;;  %v5123_v33 = vld [vmem:[#allocation5 + $0x140] ss:$12 sps:$4 sm:$0xff]  }
 0x106   :  { %1756 = vmatpush1.bf16.msra.mxu0 %v5008_v34  ;;  %v5124_v34 = vld [vmem:[#allocation5 + $0x80] ss:$12 sps:$4 sm:$0xff]  }
 0x107   :  { %1757 = vmatprep.subr.bf16.mxu0 %v5015_v12  ;;  %3028 = vmatpush1.bf16.msra.mxu1 %v5080_v35  ;;  %v5128_v12 = vld [vmem:[#allocation5 + $0x158] ss:$12 sps:$4 sm:$0xff]   ;;  %v5133_v35 = vld [vmem:[#allocation5 + $0x170] ss:$12 sps:$4 sm:$0xff]  }
 0x108   :  { %3029 = vmatprep.subr.bf16.mxu1 %v5085_v58  ;;  %v5134_v58 = vld [vmem:[#allocation5 + $0xb0] ss:$12 sps:$4 sm:$0xff]  }
 0x10a   :  { %1758 = vmatpush1.bf16.msra.mxu0 %v5013_v16  ;;  %v5138_v16 = vld [vmem:[#allocation5 + $0x248] ss:$12 sps:$4 sm:$0xff]  }
 0x10b   :  { %1759 = vmatprep.subr.bf16.mxu0 %v5020_v36  ;;  %3030 = vmatpush1.bf16.msra.mxu1 %v5083_v37  ;;  %v5610_v36 = vsub.s32 0, %v5575_v45  ;;  %v5615_v37 = vld [vmem:[%s5779_s6] sm:$0xff] }
 0x10c   :  { %3031 = vmatprep.subr.bf16.mxu1 %v5088_v38  ;;  %v5618_v38 = vsub.s32 1, %v5575_v45 }
 0x10e   :  { %1760 = vmatpush1.bf16.msra.mxu0 %v5018_v39  ;;  %v342_v39 = vsub.s32 3, %v5575_v45 }
 0x10f   :  { %1761 = vmatprep.subr.bf16.mxu0 %v5025_v40  ;;  %3032 = vmatpush1.bf16.msra.mxu1 %v5086_v41  ;;  %v331_v40 = vrot.slane %v5615_v37, %v5610_v36  ;;  %v335_v41 = vrot.slane %v5615_v37, %v5618_v38 }
 0x110   :  { %3033 = vmatprep.subr.bf16.mxu1 %v5091_v42  ;;  %v343_v42 = vrot.slane %v5615_v37, %v342_v39  ;;  %v5226_v39 = vld [vmem:[#allocation5 + $0x3c8] ss:$12 sps:$4 sm:$0xff]  }
 0x112   :  { %1762 = vmatpush1.bf16.msra.mxu0 %v5023_v43 }
 0x113   :  { %1763 = vmatprep.subr.bf16.mxu0 %v5030_v44  ;;  %3034 = vmatpush1.bf16.msra.mxu1 %v5089_v46 }
 0x114   :  { %3035 = vmatprep.subr.bf16.mxu1 %v5094_v47 }
 0x116   :  { %1764 = vmatpush1.bf16.msra.mxu0 %v5028_v48 }
 0x117   :  { %1765 = vmatprep.subr.bf16.mxu0 %v5035_v49  ;;  %3036 = vmatpush1.bf16.msra.mxu1 %v5092_v50 }
 0x118   :  { %3037 = vmatprep.subr.bf16.mxu1 %v5097_v52 }
 0x11a   :  { %1766 = vmatpush1.bf16.msra.mxu0 %v5033_v51 }
 0x11b   :  { %1767 = vmatprep.subr.bf16.mxu0 %v5040_v53  ;;  %3038 = vmatpush1.bf16.msra.mxu1 %v5095_v54 }
 0x11c   :  { %3039 = vmatprep.subr.bf16.mxu1 %v5102_v55 }
 0x11e   :  { %1768 = vmatpush1.bf16.msra.mxu0 %v5038_v56 }
 0x11f   :  { %1769 = vmatprep.subr.bf16.mxu0 %v5045_v57  ;;  %3040 = vmatpush1.bf16.msra.mxu1 %v5100_v59 }
 0x120   :  { %3041 = vmatprep.subr.bf16.mxu1 %v5107_v60  ;;  %v5135_v60 = vld [vmem:[#allocation5 + $0x180] ss:$12 sps:$4 sm:$0xff]  }
 0x122   :  { %1770 = vmatpush1.bf16.msra.mxu0 %v5043_v61  ;;  %v5139_v61 = vld [vmem:[#allocation5 + $0x188] ss:$12 sps:$4 sm:$0xff]  }
 0x123   :  { %1771 = vmatprep.subr.bf16.mxu0 %v5050_v62  ;;  %3042 = vmatpush1.bf16.msra.mxu1 %v5105_v63  ;;  %v5142_v63 = vld [vmem:[#allocation5 + $0x19c] ss:$12 sps:$4 sm:$0xff]  }
 0x124   :  { %3043 = vmatprep.subr.bf16.mxu1 %v5112_v0  ;;  %v5143_v0 = vld [vmem:[#allocation5 + $0x260] ss:$12 sps:$4 sm:$0xff]  }
 0x126   :  { %1772 = vmatpush1.bf16.msra.mxu0 %v5048_v1 }
 0x127   :  { %1773 = vmatprep.subr.bf16.mxu0 %v5055_v2  ;;  %3044 = vmatpush1.bf16.msra.mxu1 %v5110_v3  ;;  %v5140_v2 = vld [vmem:[#allocation5 + $0x198] ss:$12 sps:$4 sm:$0xff]   ;;  %v5144_v3 = vld [vmem:[#allocation5 + $0x1a0] ss:$12 sps:$4 sm:$0xff]  }
 0x128   :  { %3045 = vmatprep.subr.bf16.mxu1 %v5117_v4  ;;  %v5147_v4 = vld [vmem:[#allocation5 + $0x1b4] ss:$12 sps:$4 sm:$0xff]  }
 0x12a   :  { %1774 = vmatpush1.bf16.msra.mxu0 %v5053_v5  ;;  %v5148_v5 = vld [vmem:[#allocation5 + $0x278] ss:$12 sps:$4 sm:$0xff]  }
 0x12b   :  { %1775 = vmatprep.subr.bf16.mxu0 %v5060_v6  ;;  %3046 = vmatpush1.bf16.msra.mxu1 %v5115_v7  ;;  %v5145_v6 = vld [vmem:[#allocation5 + $0x1b0] ss:$12 sps:$4 sm:$0xff]   ;;  %v5149_v7 = vld [vmem:[#allocation5 + $0x1b8] ss:$12 sps:$4 sm:$0xff]  }
 0x12c   :  { %3047 = vmatprep.subr.bf16.mxu1 %v5122_v8  ;;  %v5152_v8 = vld [vmem:[#allocation5 + $0x1cc] ss:$12 sps:$4 sm:$0xff]  }
 0x12e   :  { %1776 = vmatpush1.bf16.msra.mxu0 %v5058_v9  ;;  %v5153_v9 = vld [vmem:[#allocation5 + $0x290] ss:$12 sps:$4 sm:$0xff]  }
 0x12f   :  { %1777 = vmatprep.subr.bf16.mxu0 %v5065_v10  ;;  %3048 = vmatpush1.bf16.msra.mxu1 %v5120_v11  ;;  %v5150_v10 = vld [vmem:[#allocation5 + $0x1c8] ss:$12 sps:$4 sm:$0xff]   ;;  %v5154_v11 = vld [vmem:[#allocation5 + $0x1d0] ss:$12 sps:$4 sm:$0xff]  }
 0x130   :  { %3049 = vmatprep.subr.bf16.mxu1 %v5127_v13  ;;  %v5157_v13 = vld [vmem:[#allocation5 + $0x1e4] ss:$12 sps:$4 sm:$0xff]  }
 0x132   :  { %1778 = vmatpush1.bf16.msra.mxu0 %v5063_v14  ;;  %v5158_v14 = vld [vmem:[#allocation5 + $0x2a8] ss:$12 sps:$4 sm:$0xff]  }
 0x133   :  { %1779 = vmatprep.subr.bf16.mxu0 %v5070_v15  ;;  %3050 = vmatpush1.bf16.msra.mxu1 %v5125_v18  ;;  %v5155_v15 = vld [vmem:[#allocation5 + $0x1e0] ss:$12 sps:$4 sm:$0xff]   ;;  %v5159_v18 = vld [vmem:[#allocation5 + $0x1e8] ss:$12 sps:$4 sm:$0xff]  }
 0x134   :  { %3051 = vmatprep.subr.bf16.mxu1 %v5132_v20  ;;  %v5162_v20 = vld [vmem:[#allocation5 + $0x1fc] ss:$12 sps:$4 sm:$0xff]  }
 0x136   :  { %1780 = vmatpush1.bf16.msra.mxu0 %v5068_v19  ;;  %v338_v19 = vsub.s32 2, %v5575_v45 }
 0x137   :  { %4553 = vmatprep.subr.bf16.mxu0 %v5098_v21  ;;  %3052 = vmatpush1.bf16.msra.mxu1 %v5130_v22  ;;  %v5163_v21 = vld [vmem:[#allocation5 + $0x2c0] ss:$12 sps:$4 sm:$0xff]   ;;  %v5160_v22 = vld [vmem:[#allocation5 + $0x1f8] ss:$12 sps:$4 sm:$0xff]  }
 0x138   :  { %3062 = vmatprep.subr.bf16.mxu1 %v5137_v23  ;;  %v5164_v23 = vld [vmem:[#allocation5 + $0x200] ss:$12 sps:$4 sm:$0xff]  }
 0x139   :  { %1782 = vmatmul.mubr.bf16.vlgmr.msra.gmra.mrb[4].mxu0 %v5597_v17  ;;  %v5129_v17 = vld [vmem:[#allocation5 + $0x98] ss:$12 sps:$4 sm:$0xff]  }
 0x13a   :  { %4554 = vmatpush3.bf16.msra.mxu0 %v5099_v24  ;;  %v339_v24 = vrot.slane %v5615_v37, %v338_v19 }
 0x13b   :  { %4555 = vmatprep.subr.bf16.mxu0 %v5103_v25  ;;  %v5167_v25 = vld [vmem:[#allocation5 + $0x214] ss:$12 sps:$4 sm:$0xff]  }
 0x13e   :  { %4556 = vmatpush3.bf16.msra.mxu0 %v5104_v26  ;;  %v5168_v26 = vld [vmem:[#allocation5 + $0x2d8] ss:$12 sps:$4 sm:$0xff]  }
 0x13f   :  { %4557 = vmatprep.subr.bf16.mxu0 %v5108_v27  ;;  %v5165_v27 = vld [vmem:[#allocation5 + $0x210] ss:$12 sps:$4 sm:$0xff]  }
 0x142   :  { %4558 = vmatpush3.bf16.msra.mxu0 %v5109_v28  ;;  %v5169_v28 = vld [vmem:[#allocation5 + $0x218] ss:$12 sps:$4 sm:$0xff]  }
 0x143   :  { %4559 = vmatprep.subr.bf16.mxu0 %v5113_v29 }
 0x146   :  { %4560 = vmatpush3.bf16.msra.mxu0 %v5114_v30  ;;  %v5172_v30 = vld [vmem:[#allocation5 + $0x22c] ss:$12 sps:$4 sm:$0xff]  }
 0x147   :  { %4561 = vmatprep.subr.bf16.mxu0 %v5118_v31  ;;  %v5173_v31 = vld [vmem:[#allocation5 + $0x2f0] ss:$12 sps:$4 sm:$0xff]  }
 0x14a   :  { %4562 = vmatpush3.bf16.msra.mxu0 %v5119_v32 }
 0x14b   :  { %4563 = vmatprep.subr.bf16.mxu0 %v5123_v33 }
 0x14e   :  { %4564 = vmatpush3.bf16.msra.mxu0 %v5124_v34  ;;  %v5170_v34 = vld [vmem:[#allocation5 + $0x228] ss:$12 sps:$4 sm:$0xff]  }
 0x14f   :  { %4565 = vmatprep.subr.bf16.mxu0 %v5128_v12  ;;  %v5174_v12 = vld [vmem:[#allocation5 + $0x230] ss:$12 sps:$4 sm:$0xff]  }
 0x152   :  { %4566 = vmatpush3.bf16.msra.mxu0 %v5129_v17 }
 0x153   :  { %4567 = vmatprep.subr.bf16.mxu0 %v5133_v35 }
 0x156   :  { %4568 = vmatpush3.bf16.msra.mxu0 %v5134_v58 }
 0x157   :  { %4575 = vmatprep.subr.bf16.mxu0 %v5138_v16  ;;  %v5177_v16 = vld [vmem:[#allocation5 + $0x244] ss:$12 sps:$4 sm:$0xff]  }
 0x18c   :  { %v1619_v43 = vpop.f32.mrb[0].mxu0  ;;  %v5626_v44 = vpop.f32.mrb[0].mxu1 }
 0x18d   :  { %v4699_v46 = vadd.f32 %v1619_v43, %v331_v40  ;;  %v1621_v47 = vpop.f32.mrb[1].mxu0  ;;  %v1703_v48 = vpop.f32.mrb[1].mxu1  ;;  %v4701_v29 = vadd.f32 %v5626_v44, %v339_v24  ;;  %v5180_v44 = vld [vmem:[#allocation5 + $0x25c] ss:$12 sps:$4 sm:$0xff]   ;;  %v5199_v24 = vld [vmem:[#allocation5 + $0x300] ss:$12 sps:$4 sm:$0xff]  }
 0x18e   :  { %v4700_v49 = vadd.f32 %v1621_v47, %v335_v41  ;;  %v4702_v50 = vadd.f32 %v1703_v48, %v343_v42  ;;  %v1623_v51 = vpop.f32.mrb[2].mxu0  ;;  %v1705_v52 = vpop.f32.mrb[2].mxu1  ;;  %v5175_v41 = vld [vmem:[#allocation5 + $0x240] ss:$12 sps:$4 sm:$0xff]   ;;  %v5227_v42 = vld [vmem:[#allocation5 + $0x308] ss:$12 sps:$4 sm:$0xff]  }
 0x18f   :  { %v1870_v53 = vmax.f32 %v4699_v46, 0.0  ;;  %v1624_v54 = vpop.f32.mrb[3].mxu0  ;;  %v1706_v55 = vpop.f32.mrb[3].mxu1  ;;  %v1872_v58 = vmax.f32 %v4701_v29, 0.0  ;;  %v5231_v46 = vld [vmem:[#allocation5 + $0x3e0] ss:$12 sps:$4 sm:$0xff]  }
 0x190   :  { %v1871_v56 = vmax.f32 %v4700_v49, 0.0  ;;  %v1873_v57 = vmax.f32 %v4702_v50, 0.0  ;;  %v5178_v47 = vld [vmem:[#allocation5 + $0x258] ss:$12 sps:$4 sm:$0xff]   ;;  %v5232_v48 = vld [vmem:[#allocation5 + $0x320] ss:$12 sps:$4 sm:$0xff]  }
 0x191   :  { %v1877_v62 = vpack.c.bf16 %v1870_v53, %v1870_v53  ;;  %v5635_v43 = vpack.c.bf16 %v1872_v58, %v1872_v58  ;;  %v5183_v49 = vld [vmem:[#allocation5 + $0x274] ss:$12 sps:$4 sm:$0xff]   ;;  %v5236_v50 = vld [vmem:[#allocation5 + $0x3f8] ss:$12 sps:$4 sm:$0xff]   ;;  %v5181_v51 = vld [vmem:[#allocation5 + $0x270] ss:$12 sps:$4 sm:$0xff]  }
 0x192   :  { %v1878_v59 = vpack.c.bf16 %v1871_v56, %v1871_v56  ;;  %v1880_v1 = vpack.c.bf16 %v1873_v57, %v1873_v57  ;;  %v5237_v52 = vld [vmem:[#allocation5 + $0x338] ss:$12 sps:$4 sm:$0xff]   ;;  %v5241_v54 = vld [vmem:[#allocation5 + $0x410] ss:$12 sps:$4 sm:$0xff]   ;;  %v5184_v55 = vld [vmem:[#allocation5 + $0x288] ss:$12 sps:$4 sm:$0xff]  }
 0x193   :  { %v5186_v53 = vld [vmem:[#allocation5 + $0x28c] ss:$12 sps:$4 sm:$0xff]   ;;  %v5242_v56 = vld [vmem:[#allocation5 + $0x350] ss:$12 sps:$4 sm:$0xff]  }
 0x194   :  { %3053 = vmatprep.mubr.bf16.mxu1 %v1878_v59  ;;  %3217 = vmatprep.mubr.bf16.mxu0 %v1878_v59  ;;  %v5189_v57 = vld [vmem:[#allocation5 + $0x2a4] ss:$12 sps:$4 sm:$0xff]   ;;  %v5246_v59 = vld [vmem:[#allocation5 + $0x428] ss:$12 sps:$4 sm:$0xff]   ;;  %v5222_v58 = vld [vmem:[#allocation5 + $0x3ac] ss:$12 sps:$4 sm:$0xff]  }
 0x195   :  { %3054 = vmatmul.mubr.bf16.vlgmr.msra.gmra.mrb[12].mxu1 %v1877_v62  ;;  %3218 = vmatmul.mubr.bf16.vlgmr.msra.gmra.mrb[8].mxu0 %v1877_v62  ;;  %v5192_v62 = vld [vmem:[#allocation5 + $0x2bc] ss:$12 sps:$4 sm:$0xff]  }
 0x196   :  { %3063 = vmatpush1.bf16.msra.mxu1 %v5135_v60  ;;  %4576 = vmatpush3.bf16.msra.mxu0 %v5139_v61  ;;  %v5187_v60 = vld [vmem:[#allocation5 + $0x2a0] ss:$12 sps:$4 sm:$0xff]   ;;  %v5247_v61 = vld [vmem:[#allocation5 + $0x368] ss:$12 sps:$4 sm:$0xff]   ;;  %v5205_v29 = vld [vmem:[#allocation5 + $0x330] ss:$12 sps:$4 sm:$0xff]  }
 0x197   :  { %3094 = vmatprep.mubr.bf16.mxu1 %v1880_v1  ;;  %3257 = vmatprep.mubr.bf16.mxu0 %v1880_v1  ;;  %v5190_v1 = vld [vmem:[#allocation5 + $0x2b8] ss:$12 sps:$4 sm:$0xff]  }
 0x198   :  { %3064 = vmatprep.subr.bf16.mxu1 %v5142_v63  ;;  %4577 = vmatprep.subr.bf16.mxu0 %v5143_v0  ;;  %v5251_v63 = vld [vmem:[#allocation5 + $0x440] ss:$12 sps:$4 sm:$0xff]   ;;  %v354_v0 = vsub.s32 6, %v5575_v45 }
 0x19a   :  { %3065 = vmatpush1.bf16.msra.mxu1 %v5140_v2  ;;  %4578 = vmatpush3.bf16.msra.mxu0 %v5144_v3  ;;  %v5252_v2 = vld [vmem:[#allocation5 + $0x380] ss:$12 sps:$4 sm:$0xff]  }
 0x19b   :  { %3066 = vmatprep.subr.bf16.mxu1 %v5147_v4  ;;  %4579 = vmatprep.subr.bf16.mxu0 %v5148_v5  ;;  %v5195_v3 = vld [vmem:[#allocation5 + $0x2d4] ss:$12 sps:$4 sm:$0xff]   ;;  %v5256_v4 = vld [vmem:[#allocation5 + $0x458] ss:$12 sps:$4 sm:$0xff]   ;;  %v355_v5 = vrot.slane %v5615_v37, %v354_v0 }
 0x19e   :  { %3067 = vmatpush1.bf16.msra.mxu1 %v5145_v6  ;;  %4580 = vmatpush3.bf16.msra.mxu0 %v5149_v7  ;;  %v5193_v6 = vld [vmem:[#allocation5 + $0x2d0] ss:$12 sps:$4 sm:$0xff]   ;;  %v5257_v7 = vld [vmem:[#allocation5 + $0x398] ss:$12 sps:$4 sm:$0xff]  }
 0x19f   :  { %3068 = vmatprep.subr.bf16.mxu1 %v5152_v8  ;;  %4581 = vmatprep.subr.bf16.mxu0 %v5153_v9  ;;  %v5198_v8 = vld [vmem:[#allocation5 + $0x2ec] ss:$12 sps:$4 sm:$0xff]   ;;  %v5261_v9 = vld [vmem:[#allocation5 + $0x470] ss:$12 sps:$4 sm:$0xff]  }
 0x1a2   :  { %3069 = vmatpush1.bf16.msra.mxu1 %v5150_v10  ;;  %4582 = vmatpush3.bf16.msra.mxu0 %v5154_v11 }
 0x1a3   :  { %3070 = vmatprep.subr.bf16.mxu1 %v5157_v13  ;;  %4583 = vmatprep.subr.bf16.mxu0 %v5158_v14  ;;  %v5196_v14 = vld [vmem:[#allocation5 + $0x2e8] ss:$12 sps:$4 sm:$0xff]  }
 0x1a6   :  { %3071 = vmatpush1.bf16.msra.mxu1 %v5155_v15  ;;  %4584 = vmatpush3.bf16.msra.mxu0 %v5159_v18  ;;  %v5262_v18 = vld [vmem:[#allocation5 + $0x3b0] ss:$12 sps:$4 sm:$0xff]  }
 0x1a7   :  { %3072 = vmatprep.subr.bf16.mxu1 %v5162_v20  ;;  %4585 = vmatprep.subr.bf16.mxu0 %v5163_v21  ;;  %v5201_v21 = vld [vmem:[#allocation5 + $0x304] ss:$12 sps:$4 sm:$0xff]  }
 0x1aa   :  { %3073 = vmatpush1.bf16.msra.mxu1 %v5160_v22  ;;  %4586 = vmatpush3.bf16.msra.mxu0 %v5164_v23 }
 0x1ab   :  { %3074 = vmatprep.subr.bf16.mxu1 %v5167_v25  ;;  %4587 = vmatprep.subr.bf16.mxu0 %v5168_v26  ;;  %v5204_v25 = vld [vmem:[#allocation5 + $0x31c] ss:$12 sps:$4 sm:$0xff]   ;;  %v5495_v26 = vmov 0.0  }
 0x1ac   :  { %v4525_v32 = vpop.f32.mrb[4].mxu1 }
 0x1ad   :  { %v4526_v33 = vpop.f32.mrb[5].mxu1 }
 0x1ae   :  { %3075 = vmatpush1.bf16.msra.mxu1 %v5165_v27  ;;  %4588 = vmatpush3.bf16.msra.mxu0 %v5169_v28  ;;  %v5633_v17 = vadd.f32 %v4526_v33, %v4525_v32  ;;  %v4528_v35 = vpop.f32.mrb[6].mxu1  ;;  %v5202_v27 = vld [vmem:[#allocation5 + $0x318] ss:$12 sps:$4 sm:$0xff]   ;;  %v5207_v28 = vld [vmem:[#allocation5 + $0x334] ss:$12 sps:$4 sm:$0xff]  }
 0x1af   :  { %3076 = vmatprep.subr.bf16.mxu1 %v5172_v30  ;;  %4589 = vmatprep.subr.bf16.mxu0 %v5173_v31  ;;  %v4529_v40 = vpop.f32.mrb[7].mxu1  ;;  %v5210_v30 = vld [vmem:[#allocation5 + $0x34c] ss:$12 sps:$4 sm:$0xff]   ;;  %v5208_v31 = vld [vmem:[#allocation5 + $0x348] ss:$12 sps:$4 sm:$0xff]  }
 0x1b0   :  { %v1825_v10 = vadd.f32 %v5633_v17, %v355_v5  ;;  %v5213_v32 = vld [vmem:[#allocation5 + $0x364] ss:$12 sps:$4 sm:$0xff]   ;;  %v5211_v33 = vld [vmem:[#allocation5 + $0x360] ss:$12 sps:$4 sm:$0xff]  }
 0x1b1   :  { %v5219_v17 = vld [vmem:[#allocation5 + $0x394] ss:$12 sps:$4 sm:$0xff]   ;;  %v5217_v35 = vld [vmem:[#allocation5 + $0x390] ss:$12 sps:$4 sm:$0xff]  }
 0x1b2   :  { %3077 = vmatpush1.bf16.msra.mxu1 %v5170_v34  ;;  %4590 = vmatpush3.bf16.msra.mxu0 %v5174_v12  ;;  %v5216_v34 = vld [vmem:[#allocation5 + $0x37c] ss:$12 sps:$4 sm:$0xff]   ;;  %v5214_v12 = vld [vmem:[#allocation5 + $0x378] ss:$12 sps:$4 sm:$0xff]   ;;  %v5223_v40 = vld [vmem:[#allocation5 + $0x3c0] ss:$12 sps:$4 sm:$0xff]  }
 0x1b3   :  { %3078 = vmatprep.subr.bf16.mxu1 %v5177_v16  ;;  %4597 = vmatprep.subr.bf16.mxu0 %v5226_v39  ;;  %v5220_v16 = vld [vmem:[#allocation5 + $0x3a8] ss:$12 sps:$4 sm:$0xff]   ;;  %v5225_v39 = vld [vmem:[#allocation5 + $0x3c4] ss:$12 sps:$4 sm:$0xff]  }
 0x1b5   :  { %3258 = vmatmul.mubr.bf16.vlgmr.msra.gmra.mrb[12].mxu0 %v5635_v43 }
 0x1b6   :  { %3079 = vmatpush1.bf16.msra.mxu1 %v5175_v41  ;;  %4598 = vmatpush3.bf16.msra.mxu0 %v5227_v42  ;;  %v5230_v41 = vld [vmem:[#allocation5 + $0x3dc] ss:$12 sps:$4 sm:$0xff]   ;;  %v5228_v42 = vld [vmem:[#allocation5 + $0x3d8] ss:$12 sps:$4 sm:$0xff]  }
 0x1b7   :  { %3080 = vmatprep.subr.bf16.mxu1 %v5180_v44  ;;  %4599 = vmatprep.subr.bf16.mxu0 %v5231_v46  ;;  %v5233_v44 = vld [vmem:[#allocation5 + $0x3f0] ss:$12 sps:$4 sm:$0xff]   ;;  %v5240_v46 = vld [vmem:[#allocation5 + $0x40c] ss:$12 sps:$4 sm:$0xff]  }
 0x1ba   :  { %3081 = vmatpush1.bf16.msra.mxu1 %v5178_v47  ;;  %4600 = vmatpush3.bf16.msra.mxu0 %v5232_v48  ;;  %v5238_v47 = vld [vmem:[#allocation5 + $0x408] ss:$12 sps:$4 sm:$0xff]   ;;  %v5245_v48 = vld [vmem:[#allocation5 + $0x424] ss:$12 sps:$4 sm:$0xff]  }
 0x1bb   :  { %3082 = vmatprep.subr.bf16.mxu1 %v5183_v49  ;;  %4601 = vmatprep.subr.bf16.mxu0 %v5236_v50  ;;  %v5243_v49 = vld [vmem:[#allocation5 + $0x420] ss:$12 sps:$4 sm:$0xff]   ;;  %v5250_v50 = vld [vmem:[#allocation5 + $0x43c] ss:$12 sps:$4 sm:$0xff]  }
 0x1be   :  { %3083 = vmatpush1.bf16.msra.mxu1 %v5181_v51  ;;  %4602 = vmatpush3.bf16.msra.mxu0 %v5237_v52  ;;  %v346_v51 = vsub.s32 4, %v5575_v45  ;;  %v5248_v52 = vld [vmem:[#allocation5 + $0x438] ss:$12 sps:$4 sm:$0xff]  }
 0x1bf   :  { %3084 = vmatprep.subr.bf16.mxu1 %v5186_v53  ;;  %4603 = vmatprep.subr.bf16.mxu0 %v5241_v54  ;;  %v350_v53 = vsub.s32 5, %v5575_v45  ;;  %v5255_v54 = vld [vmem:[#allocation5 + $0x454] ss:$12 sps:$4 sm:$0xff]  }
 0x1c0   :  { %v5367_v45 = vld [vmem:[%s5777_s4 + $0x40] sm:$0xff]  }
 0x1c2   :  { %3085 = vmatpush1.bf16.msra.mxu1 %v5184_v55  ;;  %4604 = vmatpush3.bf16.msra.mxu0 %v5242_v56  ;;  %v347_v55 = vrot.slane %v5615_v37, %v346_v51  ;;  %v5253_v56 = vld [vmem:[#allocation5 + $0x450] ss:$12 sps:$4 sm:$0xff]   ;;  %v5313_v51 = vld [vmem:[#allocation7 + $0x60] ss:$8 sps:$4 sm:$0xff]  }
 0x1c3   :  { %3086 = vmatprep.subr.bf16.mxu1 %v5189_v57  ;;  %4605 = vmatprep.subr.bf16.mxu0 %v5246_v59  ;;  %v351_v57 = vrot.slane %v5615_v37, %v350_v53  ;;  %v5260_v59 = vld [vmem:[#allocation5 + $0x46c] ss:$12 sps:$4 sm:$0xff]   ;;  %v5269_v37 = vld [vmem:[#allocation5 + $0x49c] ss:$12 sps:$4 sm:$0xff]  }
 0x1c6   :  { %3087 = vmatpush1.bf16.msra.mxu1 %v5187_v60  ;;  %4606 = vmatpush3.bf16.msra.mxu0 %v5247_v61 }
 0x1c7   :  { %3088 = vmatprep.subr.bf16.mxu1 %v5192_v62  ;;  %4607 = vmatprep.subr.bf16.mxu0 %v5251_v63 }
 0x1ca   :  { %3089 = vmatpush1.bf16.msra.mxu1 %v5190_v1  ;;  %4608 = vmatpush3.bf16.msra.mxu0 %v5252_v2  ;;  %v5258_v1 = vld [vmem:[#allocation5 + $0x468] ss:$12 sps:$4 sm:$0xff]  }
 0x1cb   :  { %3090 = vmatprep.subr.bf16.mxu1 %v5195_v3  ;;  %4609 = vmatprep.subr.bf16.mxu0 %v5256_v4  ;;  %v5265_v4 = vld [vmem:[#allocation5 + $0x484] ss:$12 sps:$4 sm:$0xff]  }
 0x1cc   :  { %v4547_v11 = vpop.f32.mrb[8].mxu1 }
 0x1cd   :  { %v4548_v13 = vpop.f32.mrb[9].mxu1 }
 0x1ce   :  { %3091 = vmatpush1.bf16.msra.mxu1 %v5193_v6  ;;  %v4549_v15 = vadd.f32 %v4548_v13, %v4547_v11  ;;  %4610 = vmatpush3.bf16.msra.mxu0 %v5257_v7  ;;  %v4550_v20 = vpop.f32.mrb[10].mxu1  ;;  %v5263_v7 = vld [vmem:[#allocation5 + $0x480] ss:$12 sps:$4 sm:$0xff]  }
 0x1cf   :  { %3092 = vmatprep.subr.bf16.mxu1 %v5198_v8  ;;  %4611 = vmatprep.subr.bf16.mxu0 %v5261_v9  ;;  %v4551_v22 = vpop.f32.mrb[11].mxu1  ;;  %v5266_v8 = vld [vmem:[#allocation5 + $0x488] ss:$12 sps:$4 sm:$0xff]   ;;  %v5270_v11 = vld [vmem:[#allocation5 + $0x4a0] ss:$12 sps:$4 sm:$0xff]  }
 0x1d0   :  { %v5641_v23 = vadd.f32 %v4549_v15, %v1825_v10  ;;  %v5267_v10 = vld [vmem:[#allocation5 + $0x498] ss:$12 sps:$4 sm:$0xff]   ;;  %v5273_v13 = vld [vmem:[#allocation5 + $0x4b4] ss:$12 sps:$4 sm:$0xff]   ;;  %v5271_v15 = vld [vmem:[#allocation5 + $0x4b0] ss:$12 sps:$4 sm:$0xff]  }
 0x1d1   :  { %v5277_v20 = vld [vmem:[#allocation5 + $0x4cc] ss:$12 sps:$4 sm:$0xff]   ;;  %v5278_v22 = vld [vmem:[#allocation5 + $0x4d0] ss:$12 sps:$4 sm:$0xff]  }
 0x1d2   :  { %3093 = vmatpush1.bf16.msra.mxu1 %v5196_v14  ;;  %4612 = vmatpush3.bf16.msra.mxu0 %v5262_v18  ;;  %v5496_v14 = vmov 0   ;;  %v5274_v18 = vld [vmem:[#allocation5 + $0x4b8] ss:$12 sps:$4 sm:$0xff]  }
 0x1d3   :  { %3103 = vmatprep.subr.bf16.mxu1 %v5201_v21  ;;  %4659 = vmatprep.subr.bf16.mxu0 %v5495_v26  ;;  %v5275_v21 = vld [vmem:[#allocation5 + $0x4c8] ss:$12 sps:$4 sm:$0xff]  }
 0x1d5   :  { %3095 = vmatmul.mubr.bf16.vlgmr.msra.gmra.mrb[12].mxu1 %v5635_v43  ;;  %v5235_v43 = vld [vmem:[#allocation5 + $0x3f4] ss:$12 sps:$4 sm:$0xff]  }
 0x1d6   :  { %3104 = vmatpush1.bf16.msra.mxu1 %v5199_v24  ;;  %v5281_v24 = vld [vmem:[#allocation5 + $0x4e4] ss:$12 sps:$4 sm:$0xff]  }
 0x1d7   :  { %3105 = vmatprep.subr.bf16.mxu1 %v5204_v25  ;;  %v5279_v25 = vld [vmem:[#allocation5 + $0x4e0] ss:$12 sps:$4 sm:$0xff]  }
 0x1da   :  { %3106 = vmatpush1.bf16.msra.mxu1 %v5202_v27  ;;  %v5282_v27 = vld [vmem:[#allocation5 + $0x4e8] ss:$12 sps:$4 sm:$0xff]  }
 0x1db   :  { %3107 = vmatprep.subr.bf16.mxu1 %v5207_v28  ;;  %v5285_v28 = vld [vmem:[#allocation5 + $0x4fc] ss:$12 sps:$4 sm:$0xff]  }
 0x1de   :  { %3108 = vmatpush1.bf16.msra.mxu1 %v5205_v29  ;;  %v5283_v29 = vld [vmem:[#allocation5 + $0x4f8] ss:$12 sps:$4 sm:$0xff]  }
 0x1df   :  { %3109 = vmatprep.subr.bf16.mxu1 %v5210_v30  ;;  %v5286_v30 = vld [vmem:[#allocation5 + $0x500] ss:$12 sps:$4 sm:$0xff]  }
 0x1e2   :  { %3110 = vmatpush1.bf16.msra.mxu1 %v5208_v31  ;;  %v5289_v31 = vld [vmem:[#allocation5 + $0x514] ss:$12 sps:$4 sm:$0xff]  }
 0x1e3   :  { %3111 = vmatprep.subr.bf16.mxu1 %v5213_v32  ;;  %v5287_v32 = vld [vmem:[#allocation5 + $0x510] ss:$12 sps:$4 sm:$0xff]  }
 0x1e6   :  { %3112 = vmatpush1.bf16.msra.mxu1 %v5211_v33  ;;  %v5290_v33 = vld [vmem:[#allocation5 + $0x518] ss:$12 sps:$4 sm:$0xff]  }
 0x1e7   :  { %3113 = vmatprep.subr.bf16.mxu1 %v5216_v34  ;;  %v5293_v34 = vld [vmem:[#allocation5 + $0x52c] ss:$12 sps:$4 sm:$0xff]  }
 0x1ea   :  { %3114 = vmatpush1.bf16.msra.mxu1 %v5214_v12  ;;  %v5291_v12 = vld [vmem:[#allocation5 + $0x528] ss:$12 sps:$4 sm:$0xff]  }
 0x1eb   :  { %3115 = vmatprep.subr.bf16.mxu1 %v5219_v17  ;;  %v5294_v17 = vld [vmem:[#allocation5 + $0x530] ss:$12 sps:$4 sm:$0xff]  }
 0x1ee   :  { %3116 = vmatpush1.bf16.msra.mxu1 %v5217_v35  ;;  %v1876_v35 = vmax.f32 %v5641_v23, 0.0  ;;  %v5306_v23 = vld [vmem:[#allocation7 + $0x34] ss:$8 sps:$4 sm:$0xff]  }
 0x1ef   :  { %3117 = vmatprep.subr.bf16.mxu1 %v5222_v58  ;;  %v5297_v58 = vld [vmem:[#allocation7 + $0x4] ss:$8 sps:$4 sm:$0xff]  }
 0x1f2   :  { %3118 = vmatpush1.bf16.msra.mxu1 %v5220_v16  ;;  %v5295_v16 = vld [vmem:[#allocation7] ss:$8 sps:$4 sm:$0xff]  }
 0x1f3   :  { %3119 = vmatprep.subr.bf16.mxu1 %v5225_v39  ;;  %v1883_v39 = vpack.c.bf16 %v1876_v35, %v1876_v35  ;;  %v5378_v35 = vld [vmem:[%s5777_s4 + $0x28] sm:$0xff]  }
 0x1f6   :  { %3120 = vmatpush1.bf16.msra.mxu1 %v5223_v40  ;;  %v5300_v40 = vld [vmem:[#allocation7 + $0x14] ss:$8 sps:$4 sm:$0xff]  }
 0x1f7   :  { %3121 = vmatprep.subr.bf16.mxu1 %v5230_v41  ;;  %v5298_v41 = vld [vmem:[#allocation7 + $0x10] ss:$8 sps:$4 sm:$0xff]  }
 0x1fa   :  { %3122 = vmatpush1.bf16.msra.mxu1 %v5228_v42  ;;  %v5303_v42 = vld [vmem:[#allocation7 + $0x24] ss:$8 sps:$4 sm:$0xff]  }
 0x1fb   :  { %3123 = vmatprep.subr.bf16.mxu1 %v5235_v43  ;;  %v5301_v43 = vld [vmem:[#allocation7 + $0x20] ss:$8 sps:$4 sm:$0xff]  }
 0x1fe   :  { %3124 = vmatpush1.bf16.msra.mxu1 %v5233_v44  ;;  %v5304_v44 = vld [vmem:[#allocation7 + $0x30] ss:$8 sps:$4 sm:$0xff]  }
 0x1ff   :  { %3125 = vmatprep.subr.bf16.mxu1 %v5240_v46  ;;  %v5309_v46 = vld [vmem:[#allocation7 + $0x44] ss:$8 sps:$4 sm:$0xff]  }
 0x202   :  { %3126 = vmatpush1.bf16.msra.mxu1 %v5238_v47  ;;  %v5307_v47 = vld [vmem:[#allocation7 + $0x40] ss:$8 sps:$4 sm:$0xff]  }
 0x203   :  { %3127 = vmatprep.subr.bf16.mxu1 %v5245_v48  ;;  %v5312_v48 = vld [vmem:[#allocation7 + $0x54] ss:$8 sps:$4 sm:$0xff]  }
 0x206   :  { %3128 = vmatpush1.bf16.msra.mxu1 %v5243_v49  ;;  %v5310_v49 = vld [vmem:[#allocation7 + $0x50] ss:$8 sps:$4 sm:$0xff]  }
 0x207   :  { %3129 = vmatprep.subr.bf16.mxu1 %v5250_v50  ;;  %v5315_v50 = vld [vmem:[#allocation7 + $0x64] ss:$8 sps:$4 sm:$0xff]  }
 0x20a   :  { %3130 = vmatpush1.bf16.msra.mxu1 %v5248_v52 }
 0x20b   :  { %3131 = vmatprep.subr.bf16.mxu1 %v5255_v54 }
 0x20c   :  { %v1783_v60 = vpop.f32.mrb[4].mxu0 }
 0x20d   :  { %v4703_v61 = vadd.f32 %v1783_v60, %v347_v55  ;;  %v1785_v62 = vpop.f32.mrb[5].mxu0  ;;  %v5321_v60 = vld [vmem:[#allocation7 + $0x84] ss:$8 sps:$4 sm:$0xff]  }
 0x20e   :  { %v4704_v63 = vadd.f32 %v1785_v62, %v351_v57  ;;  %3132 = vmatpush1.bf16.msra.mxu1 %v5253_v56  ;;  %v1787_v0 = vpop.f32.mrb[6].mxu0  ;;  %v5318_v56 = vld [vmem:[#allocation7 + $0x74] ss:$8 sps:$4 sm:$0xff]  }
 0x20f   :  { %v1874_v2 = vmax.f32 %v4703_v61, 0.0  ;;  %v1788_v3 = vpop.f32.mrb[7].mxu0  ;;  %3133 = vmatprep.subr.bf16.mxu1 %v5260_v59  ;;  %v5316_v59 = vld [vmem:[#allocation7 + $0x70] ss:$8 sps:$4 sm:$0xff]   ;;  %v5319_v61 = vld [vmem:[#allocation7 + $0x80] ss:$8 sps:$4 sm:$0xff]  }
 0x210   :  { %v1875_v5 = vmax.f32 %v4704_v63, 0.0  ;;  %v5324_v62 = vld [vmem:[#allocation7 + $0x94] ss:$8 sps:$4 sm:$0xff]   ;;  %v5322_v63 = vld [vmem:[#allocation7 + $0x90] ss:$8 sps:$4 sm:$0xff]  }
 0x211   :  { %v1881_v9 = vpack.c.bf16 %v1874_v2, %v1874_v2  ;;  %v5327_v0 = vld [vmem:[#allocation7 + $0xa4] ss:$8 sps:$4 sm:$0xff]   ;;  %v5330_v2 = vld [vmem:[#allocation7 + $0xb4] ss:$8 sps:$4 sm:$0xff]   ;;  %v5328_v3 = vld [vmem:[#allocation7 + $0xb0] ss:$8 sps:$4 sm:$0xff]  }
 0x212   :  { %v1882_v6 = vpack.c.bf16 %v1875_v5, %v1875_v5  ;;  %3134 = vmatpush1.bf16.msra.mxu1 %v5258_v1  ;;  %v5325_v1 = vld [vmem:[#allocation7 + $0xa0] ss:$8 sps:$4 sm:$0xff]  }
 0x213   :  { %3144 = vmatprep.subr.bf16.mxu1 %v5265_v4  ;;  %v5333_v4 = vld [vmem:[#allocation7 + $0xc4] ss:$8 sps:$4 sm:$0xff]   ;;  %v5331_v5 = vld [vmem:[#allocation7 + $0xc0] ss:$8 sps:$4 sm:$0xff]  }
 0x214   :  { %3135 = vmatprep.mubr.bf16.mxu1 %v1882_v6  ;;  %3297 = vmatprep.mubr.bf16.mxu0 %v1882_v6  ;;  %v5336_v6 = vld [vmem:[#allocation7 + $0xd4] ss:$8 sps:$4 sm:$0xff]  }
 0x215   :  { %3136 = vmatmul.mubr.bf16.vlgmr.msra.gmra.mrb[12].mxu1 %v1881_v9  ;;  %3298 = vmatmul.mubr.bf16.vlgmr.msra.gmra.mrb[16].mxu0 %v1881_v9 }
 0x216   :  { %3145 = vmatpush1.bf16.msra.mxu1 %v5263_v7  ;;  %4660 = vmatpush3.bf16.msra.mxu0 %v5266_v8  ;;  %v5334_v7 = vld [vmem:[#allocation7 + $0xd0] ss:$8 sps:$4 sm:$0xff]   ;;  %v2108_v8 = vld [vmem:[%s5779_s6 + $0x7] sm:$0x7] }
 0x217   :  { %3146 = vmatprep.subr.bf16.mxu1 %v5269_v37  ;;  %4661 = vmatprep.subr.bf16.mxu0 %v5495_v26  ;;  %v2121_v9 = vrot.slane %v2108_v8, %v338_v19  ;;  %v5339_v37 = vld [vmem:[#allocation7 + $0xe4] ss:$8 sps:$4 sm:$0xff]  }
 0x218   :  { %3176 = vmatprep.mubr.bf16.mxu1 %v5496_v14  ;;  %4675 = vmatprep.mubr.msk.bf16.mxu0 %vm5497_vm0, %v5495_v26  ;;  %v5368_v19 = vld [vmem:[%s5777_s4] sm:$0xff]  }
 0x21a   :  { %3147 = vmatpush1.bf16.msra.mxu1 %v5267_v10  ;;  %4662 = vmatpush3.bf16.msra.mxu0 %v5270_v11  ;;  %v5337_v10 = vld [vmem:[#allocation7 + $0xe0] ss:$8 sps:$4 sm:$0xff]  }
 0x21b   :  { %3148 = vmatprep.subr.bf16.mxu1 %v5273_v13  ;;  %4663 = vmatprep.subr.bf16.mxu0 %v5495_v26 }
 0x21e   :  { %3149 = vmatpush1.bf16.msra.mxu1 %v5271_v15  ;;  %4664 = vmatpush3.bf16.msra.mxu0 %v5274_v18 }
 0x21f   :  { %3150 = vmatprep.subr.bf16.mxu1 %v5277_v20  ;;  %4665 = vmatprep.subr.bf16.mxu0 %v5495_v26 }
 0x222   :  { %3151 = vmatpush1.bf16.msra.mxu1 %v5275_v21  ;;  %4666 = vmatpush3.bf16.msra.mxu0 %v5278_v22  ;;  %v5342_v21 = vld [vmem:[#allocation7 + $0xf4] ss:$8 sps:$4 sm:$0xff]  }
 0x223   :  { %3152 = vmatprep.subr.bf16.mxu1 %v5281_v24  ;;  %4667 = vmatprep.subr.bf16.mxu0 %v5495_v26  ;;  %v5340_v24 = vld [vmem:[#allocation7 + $0xf0] ss:$8 sps:$4 sm:$0xff]  }
 0x226   :  { %3153 = vmatpush1.bf16.msra.mxu1 %v5279_v25  ;;  %4668 = vmatpush3.bf16.msra.mxu0 %v5282_v27  ;;  %v5345_v27 = vld [vmem:[#allocation7 + $0x104] ss:$8 sps:$4 sm:$0xff]  }
 0x227   :  { %3154 = vmatprep.subr.bf16.mxu1 %v5285_v28  ;;  %4669 = vmatprep.subr.bf16.mxu0 %v5495_v26  ;;  %v5369_v28 = vld [vmem:[%s5777_s4 + $0x48] sm:$0xff]  }
 0x22a   :  { %3155 = vmatpush1.bf16.msra.mxu1 %v5283_v29  ;;  %4670 = vmatpush3.bf16.msra.mxu0 %v5286_v30  ;;  %v5370_v29 = vld [vmem:[%s5777_s4 + $0x8] sm:$0xff]   ;;  %v5371_v30 = vld [vmem:[%s5777_s4 + $0x50] sm:$0xff]  }
 0x22b   :  { %3156 = vmatprep.subr.bf16.mxu1 %v5289_v31  ;;  %4671 = vmatprep.subr.bf16.mxu0 %v5495_v26  ;;  %v5372_v31 = vld [vmem:[%s5777_s4 + $0x10] sm:$0xff]  }
 0x22e   :  { %3157 = vmatpush1.bf16.msra.mxu1 %v5287_v32  ;;  %4672 = vmatpush3.bf16.msra.mxu0 %v5290_v33  ;;  %v5373_v32 = vld [vmem:[%s5777_s4 + $0x58] sm:$0xff]  }
 0x22f   :  { %3158 = vmatprep.subr.bf16.mxu1 %v5293_v34  ;;  %4673 = vmatprep.subr.bf16.mxu0 %v5495_v26  ;;  %v5374_v33 = vld [vmem:[%s5777_s4 + $0x18] sm:$0xff]   ;;  %v5375_v34 = vld [vmem:[%s5777_s4 + $0x60] sm:$0xff]  }
 0x232   :  { %3159 = vmatpush1.bf16.msra.mxu1 %v5291_v12  ;;  %4674 = vmatpush3.bf16.msra.mxu0 %v5294_v17  ;;  %v5376_v12 = vld [vmem:[%s5777_s4 + $0x20] sm:$0xff]   ;;  %v5377_v17 = vld [vmem:[%s5777_s4 + $0x68] sm:$0xff]  }
 0x233   :  { %3651 = vmatprep.subr.bf16.mxu0 %v5297_v58  ;;  %4628 = vmatprep.subr.bf16.mxu1 %v5367_v45 }
 0x235   :  { %3177 = vmatmul.mubr.bf16.vlgmr.msra.gmra.mrb[12].mxu1 %v1883_v39  ;;  %4676 = vmatmul.mubr.bf16.vlgmr.msra.gmra.mrb[20].mxu0 %v1883_v39 }
 0x236   :  { %3652 = vmatpush1.bf16.msra.mxu0 %v5295_v16  ;;  %4629 = vmatpush3.bf16.msra.mxu1 %v5368_v19 }
 0x237   :  { %3653 = vmatprep.subr.bf16.mxu0 %v5300_v40  ;;  %4630 = vmatprep.subr.bf16.mxu1 %v5369_v28 }
 0x23a   :  { %3654 = vmatpush1.bf16.msra.mxu0 %v5298_v41  ;;  %4631 = vmatpush3.bf16.msra.mxu1 %v5370_v29 }
 0x23b   :  { %3655 = vmatprep.subr.bf16.mxu0 %v5303_v42  ;;  %4632 = vmatprep.subr.bf16.mxu1 %v5371_v30 }
 0x23e   :  { %3656 = vmatpush1.bf16.msra.mxu0 %v5301_v43  ;;  %4633 = vmatpush3.bf16.msra.mxu1 %v5372_v31  ;;  %v2113_v43 = vrot.slane %v2108_v8, %v5610_v36 }
 0x23f   :  { %3657 = vmatprep.subr.bf16.mxu0 %v5306_v23  ;;  %4634 = vmatprep.subr.bf16.mxu1 %v5373_v32  ;;  %v2117_v23 = vrot.slane %v2108_v8, %v5618_v38  ;;  %v5363_v8 = vld [vmem:[#allocation7 + $0x164] ss:$8 sps:$4 sm:$0xff]  }
 0x242   :  { %3658 = vmatpush1.bf16.msra.mxu0 %v5304_v44  ;;  %4635 = vmatpush3.bf16.msra.mxu1 %v5374_v33  ;;  %v5383_v33 = vld [vmem:[%s5778_s5] sm:$0xff]  }
 0x243   :  { %3659 = vmatprep.subr.bf16.mxu0 %v5309_v46  ;;  %4636 = vmatprep.subr.bf16.mxu1 %v5375_v34 }
 0x246   :  { %3660 = vmatpush1.bf16.msra.mxu0 %v5307_v47  ;;  %4637 = vmatpush3.bf16.msra.mxu1 %v5376_v12  ;;  %v5386_v12 = vld [vmem:[%s5778_s5 + $0x18] sm:$0xff]  }
 0x247   :  { %3661 = vmatprep.subr.bf16.mxu0 %v5312_v48  ;;  %4638 = vmatprep.subr.bf16.mxu1 %v5377_v17  ;;  %v5387_v17 = vld [vmem:[%s5778_s5 + $0x20] sm:$0xff]  }
 0x24a   :  { %3662 = vmatpush1.bf16.msra.mxu0 %v5310_v49  ;;  %4639 = vmatpush3.bf16.msra.mxu1 %v5378_v35  ;;  %v5388_v35 = vld [vmem:[%s5778_s5 + $0x28] sm:$0xff]  }
 0x24b   :  { %3663 = vmatprep.subr.bf16.mxu0 %v5315_v50 }
 0x24e   :  { %3664 = vmatpush1.bf16.msra.mxu0 %v5313_v51 }
 0x24f   :  { %3665 = vmatprep.subr.bf16.mxu0 %v5318_v56 }
 0x252   :  { %3666 = vmatpush1.bf16.msra.mxu0 %v5316_v59 }
 0x253   :  { %3667 = vmatprep.subr.bf16.mxu0 %v5321_v60  ;;  %v5343_v60 = vld [vmem:[#allocation7 + $0x100] ss:$8 sps:$4 sm:$0xff]  }
 0x256   :  { %3668 = vmatpush1.bf16.msra.mxu0 %v5319_v61 }
 0x257   :  { %3669 = vmatprep.subr.bf16.mxu0 %v5324_v62  ;;  %v5348_v62 = vld [vmem:[#allocation7 + $0x114] ss:$8 sps:$4 sm:$0xff]  }
 0x25a   :  { %3670 = vmatpush1.bf16.msra.mxu0 %v5322_v63  ;;  %v5346_v63 = vld [vmem:[#allocation7 + $0x110] ss:$8 sps:$4 sm:$0xff]  }
 0x25b   :  { %3671 = vmatprep.subr.bf16.mxu0 %v5327_v0  ;;  %v5351_v0 = vld [vmem:[#allocation7 + $0x124] ss:$8 sps:$4 sm:$0xff]  }
 0x25e   :  { %3672 = vmatpush1.bf16.msra.mxu0 %v5325_v1  ;;  %v5349_v1 = vld [vmem:[#allocation7 + $0x120] ss:$8 sps:$4 sm:$0xff]  }
 0x25f   :  { %3673 = vmatprep.subr.bf16.mxu0 %v5330_v2  ;;  %v5354_v2 = vld [vmem:[#allocation7 + $0x134] ss:$8 sps:$4 sm:$0xff]  }
 0x262   :  { %3674 = vmatpush1.bf16.msra.mxu0 %v5328_v3  ;;  %v5352_v3 = vld [vmem:[#allocation7 + $0x130] ss:$8 sps:$4 sm:$0xff]  }
 0x263   :  { %3675 = vmatprep.subr.bf16.mxu0 %v5333_v4  ;;  %v5357_v4 = vld [vmem:[#allocation7 + $0x144] ss:$8 sps:$4 sm:$0xff]  }
 0x266   :  { %3676 = vmatpush1.bf16.msra.mxu0 %v5331_v5  ;;  %v5355_v5 = vld [vmem:[#allocation7 + $0x140] ss:$8 sps:$4 sm:$0xff]  }
 0x267   :  { %3677 = vmatprep.subr.bf16.mxu0 %v5336_v6  ;;  %v5360_v6 = vld [vmem:[#allocation7 + $0x154] ss:$8 sps:$4 sm:$0xff]  }
 0x268   :  { %v4569_v52 = vpop.f32.mrb[8].mxu0 }
 0x269   :  { %v4570_v53 = vpop.f32.mrb[9].mxu0 }
 0x26a   :  { %v4571_v54 = vadd.f32 %v4570_v53, %v4569_v52  ;;  %v4572_v55 = vpop.f32.mrb[10].mxu0  ;;  %3678 = vmatpush1.bf16.msra.mxu0 %v5334_v7  ;;  %v5358_v7 = vld [vmem:[#allocation7 + $0x150] ss:$8 sps:$4 sm:$0xff]  }
 0x26b   :  { %v4573_v57 = vpop.f32.mrb[11].mxu0  ;;  %3679 = vmatprep.subr.bf16.mxu0 %v5339_v37  ;;  %v5364_v37 = vld [vmem:[#allocation7 + $0x170] ss:$8 sps:$4 sm:$0xff]  }
 0x26c   :  { %v3220_v15 = vadd.f32 %v4571_v54, %v2121_v9  ;;  %v5366_v9 = vld [vmem:[#allocation7 + $0x174] ss:$8 sps:$4 sm:$0xff]  }
 0x26e   :  { %3680 = vmatpush1.bf16.msra.mxu0 %v5337_v10 }
 0x26f   :  { %3681 = vmatprep.subr.bf16.mxu0 %v5342_v21  ;;  %v3399_v21 = vld [vmem:[%s5779_s6 + $0xa] sm:$0x3] }
 0x272   :  { %3682 = vmatpush1.bf16.msra.mxu0 %v5340_v24  ;;  %v3408_v24 = vrot.slane %v3399_v21, %v5618_v38  ;;  %v5385_v38 = vld [vmem:[%s5778_s5 + $0x10] sm:$0xff]  }
 0x273   :  { %3692 = vmatprep.subr.bf16.mxu0 %v5345_v27 }
 0x288   :  { %v4591_v11 = vpop.f32.mrb[12].mxu0 }
 0x289   :  { %v4592_v13 = vpop.f32.mrb[13].mxu0 }
 0x28a   :  { %v4593_v18 = vadd.f32 %v4592_v13, %v4591_v11  ;;  %v4594_v20 = vpop.f32.mrb[14].mxu0  ;;  %v5379_v13 = vld [vmem:[%s5777_s4 + $0x70] sm:$0xff]  }
 0x28b   :  { %v4595_v22 = vpop.f32.mrb[15].mxu0  ;;  %4640 = vmatprep.subr.bf16.mxu1 %v5379_v13  ;;  %v5382_v20 = vld [vmem:[%s5777_s4 + $0x38] sm:$0xff]  }
 0x28c   :  { %v3260_v25 = vadd.f32 %v4593_v18, %v3220_v15  ;;  %v5380_v15 = vld [vmem:[%s5777_s4 + $0x30] sm:$0xff]   ;;  %v5381_v18 = vld [vmem:[%s5777_s4 + $0x78] sm:$0xff]   ;;  %v3404_v22 = vrot.slane %v3399_v21, %v5610_v36  ;;  %v5384_v36 = vld [vmem:[%s5778_s5 + $0x8] sm:$0xff]  }
 0x28d   :  { %4641 = vmatpush3.bf16.msra.mxu1 %v5380_v15 }
 0x28e   :  { %4642 = vmatprep.subr.bf16.mxu1 %v5381_v18 }
 0x291   :  { %4643 = vmatpush3.bf16.msra.mxu1 %v5382_v20 }
 0x292   :  { %4679 = vmatprep.subr.bf16.mxu1 %v5495_v26 }
 0x2e8   :  { %v4613_v58 = vpop.f32.mrb[16].mxu0 }
 0x2e9   :  { %v4614_v16 = vpop.f32.mrb[17].mxu0 }
 0x2ea   :  { %v4615_v39 = vadd.f32 %v4614_v16, %v4613_v58  ;;  %v4616_v40 = vpop.f32.mrb[18].mxu0  ;;  %v5389_v58 = vld [vmem:[%s5778_s5 + $0x30] sm:$0xff]   ;;  %v5390_v16 = vld [vmem:[%s5778_s5 + $0x38] sm:$0xff]   ;;  %s4032_s5 = sshll.u32 %s5498_s21, 4  ;;  %s4033_s5 = int_to_ptr.vmem [resolvable:$true] %s4032_s5 }
 0x2eb   :  { %v4617_v41 = vpop.f32.mrb[19].mxu0  ;;  %v4483_v40 = vld [vmem:[%s5779_s6 + $0xc] ss:$0 sm:$0xff]  ;;  %s5457_s22 = scalar_lea.vmem %s4033_s5, 32  ;;  %p5462_p11 = scmp.lt.s32.totalorder %s4033_s5, %s4033_s5 }
 0x2ec   :  { %v3300_v42 = vadd.f32 %v4615_v39, %v3260_v25  ;;  %p5458_p10 = scmp.ne.s32.totalorder %s4033_s5, %s5457_s22  ;;  %p5463_p12 = scmp.lt.s32.totalorder %s5457_s22, %s5457_s22 }
 0x2ee   :  { %p5464_p13 = por %p5463_p12, %p5462_p11 }
 0x2f0   :  { %p5465_p0 = pnand %p5464_p13, %p5458_p10 }
 0x308   :  { %v3178_v44 = vpop.f32.mrb[12].mxu1  ;;  %v3339_v46 = vpop.f32.mrb[20].mxu0 }
 0x309   :  { %v4705_v47 = vadd.f32 %v3178_v44, %v2113_v43  ;;  %v3340_v48 = vadd.f32 %v3339_v46, %v3300_v42  ;;  %v3180_v49 = vpop.f32.mrb[13].mxu1  ;;  %v4677_v50 = vpop.f32.mrb[21].mxu0 }
 0x30a   :  { %v4706_v51 = vadd.f32 %v3180_v49, %v2117_v23  ;;  %v3182_v52 = vpop.f32.mrb[14].mxu1  ;;  %v3342_v53 = vpop.f32.mrb[22].mxu0 }
 0x30b   :  { %v3345_v54 = vmax.f32 %v4705_v47, 0.0  ;;  %v3183_v55 = vpop.f32.mrb[15].mxu1  ;;  %v4678_v56 = vpop.f32.mrb[23].mxu0  ;;  %v3347_v10 = vmax.f32 %v3340_v48, 0.0 }
 0x30c   :  { %v3346_v57 = vmax.f32 %v4706_v51, 0.0 }
 0x30d   :  { %v3348_v61 = vpack.c.bf16 %v3345_v54, %v3345_v54  ;;  %v3350_v11 = vpack.c.bf16 %v3347_v10, %v3347_v10 }
 0x30e   :  { %v3349_v59 = vpack.c.bf16 %v3346_v57, %v3346_v57 }
 0x310   :  { %3683 = vmatprep.mubr.bf16.mxu0 %v3349_v59 }
 0x311   :  { %3684 = vmatmul.mubr.bf16.vlgmr.msra.gmra.mrb[24].mxu0 %v3348_v61 }
 0x312   :  { %3693 = vmatpush1.bf16.msra.mxu0 %v5343_v60  ;;  %3724 = vmatprep.mubr.bf16.mxu0 %v5496_v14  ;;  %v5361_v14 = vld [vmem:[#allocation7 + $0x160] ss:$8 sps:$4 sm:$0xff]  }
 0x313   :  { %3694 = vmatprep.subr.bf16.mxu0 %v5348_v62 }
 0x316   :  { %3695 = vmatpush1.bf16.msra.mxu0 %v5346_v63 }
 0x317   :  { %3696 = vmatprep.subr.bf16.mxu0 %v5351_v0 }
 0x31a   :  { %3697 = vmatpush1.bf16.msra.mxu0 %v5349_v1 }
 0x31b   :  { %3698 = vmatprep.subr.bf16.mxu0 %v5354_v2 }
 0x31e   :  { %3699 = vmatpush1.bf16.msra.mxu0 %v5352_v3 }
 0x31f   :  { %3700 = vmatprep.subr.bf16.mxu0 %v5357_v4 }
 0x322   :  { %3701 = vmatpush1.bf16.msra.mxu0 %v5355_v5 }
 0x323   :  { %3702 = vmatprep.subr.bf16.mxu0 %v5360_v6 }
 0x326   :  { %3703 = vmatpush1.bf16.msra.mxu0 %v5358_v7 }
 0x327   :  { %3704 = vmatprep.subr.bf16.mxu0 %v5363_v8 }
 0x32a   :  { %3705 = vmatpush1.bf16.msra.mxu0 %v5361_v14 }
 0x32b   :  { %3706 = vmatprep.subr.bf16.mxu0 %v5366_v9 }
 0x32e   :  { %3707 = vmatpush1.bf16.msra.mxu0 %v5364_v37 }
 0x331   :  { %3725 = vmatmul.mubr.bf16.vlgmr.msra.gmra.mrb[24].mxu0 %v3350_v11 }
 0x404   :  { %v3726_v25 = vpop.f32.mrb[24].mxu0 }
 0x405   :  { %v4707_v27 = vadd.f32 %v3726_v25, %v3404_v22  ;;  %v3728_v45 = vpop.f32.mrb[25].mxu0 }
 0x406   :  { %v4708_v19 = vadd.f32 %v3728_v45, %v3408_v24  ;;  %v3730_v28 = vpop.f32.mrb[26].mxu0 }
 0x407   :  { %v3733_v29 = vmax.f32 %v4707_v27, 0.0  ;;  %v3731_v30 = vpop.f32.mrb[27].mxu0 }
 0x408   :  { %v3734_v31 = vmax.f32 %v4708_v19, 0.0 }
 0x409   :  { %v3735_v34 = vpack.c.bf16 %v3733_v29, %v3733_v29 }
 0x40a   :  { %v3736_v32 = vpack.c.bf16 %v3734_v31, %v3734_v31 }
 0x40c   :  { %3904 = vmatprep.mubr.bf16.mxu1 %v3736_v32 }
 0x40d   :  { %3905 = vmatmul.mubr.bf16.vlgmr.msra.gmra.mrb[16].mxu1 %v3735_v34 }
 0x40e   :  { %4680 = vmatpush3.bf16.msra.mxu1 %v5383_v33  ;;  %4695 = vmatprep.mubr.msk.bf16.mxu1 %vm5497_vm0, %v5495_v26 }
 0x40f   :  { %4681 = vmatprep.subr.bf16.mxu1 %v5495_v26 }
 0x412   :  { %4682 = vmatpush3.bf16.msra.mxu1 %v5384_v36 }
 0x413   :  { %4683 = vmatprep.subr.bf16.mxu1 %v5495_v26 }
 0x416   :  { %4684 = vmatpush3.bf16.msra.mxu1 %v5385_v38 }
 0x417   :  { %4685 = vmatprep.subr.bf16.mxu1 %v5495_v26 }
 0x41a   :  { %4686 = vmatpush3.bf16.msra.mxu1 %v5386_v12 }
 0x41b   :  { %4687 = vmatprep.subr.bf16.mxu1 %v5495_v26 }
 0x41e   :  { %4688 = vmatpush3.bf16.msra.mxu1 %v5387_v17 }
 0x41f   :  { %4689 = vmatprep.subr.bf16.mxu1 %v5495_v26 }
 0x422   :  { %4690 = vmatpush3.bf16.msra.mxu1 %v5388_v35 }
 0x423   :  { %4691 = vmatprep.subr.bf16.mxu1 %v5495_v26 }
 0x426   :  { %4692 = vmatpush3.bf16.msra.mxu1 %v5389_v58 }
 0x427   :  { %4693 = vmatprep.subr.bf16.mxu1 %v5495_v26  ;;  %v4500_v26 = vld [vmem:[%s5779_s6 + $0xd] ss:$0 sm:$0xff] }
 0x42a   :  { %4694 = vmatpush3.bf16.msra.mxu1 %v5390_v16 }
 0x4e0   :  { %v4644_v39 = vpop.f32.mrb[16].mxu1 }
 0x4e1   :  { %v4645_v41 = vpop.f32.mrb[17].mxu1 }
 0x4e2   :  { %v4646_v42 = vadd.f32 %v4645_v41, %v4644_v39  ;;  %v4647_v43 = vpop.f32.mrb[18].mxu1 }
 0x4e3   :  { %v4648_v23 = vpop.f32.mrb[19].mxu1 }
 0x4e4   :  { %v3907_v44 = vadd.f32 %v4646_v42, %v4483_v40 }
 0x4e6   :  { %v3912_v46 = vmax.f32 %v3907_v44, 0.0 }
 0x4e8   :  { %v3913_v47 = vpack.c.bf16 %v3912_v46, %v3912_v46 }
 0x4ea   :  { %4696 = vmatmul.mubr.bf16.vlgmr.msra.gmra.mrb[20].mxu1 %v3913_v47 }
 0x5bd   :  { %v4019_v48 = vpop.f32.mrb[20].mxu1 }
 0x5be   :  { %v4020_v49 = vadd.f32 %v4500_v26, %v4019_v48  ;;  %v4697_v50 = vpop.f32.mrb[21].mxu1 }
 0x5bf   :  { %v4022_v51 = vpop.f32.mrb[22].mxu1 }
 0x5c0   :  { %4025 = vst [vmem:[#allocation8] sm:$0x3] %v4020_v49  ;;  %v4698_v52 = vpop.f32.mrb[23].mxu1 }
 0x5c1   :  { %5468 = shalt.err (!%p5465_p0)
}
 0x5c2   :  { %s5469_s6 = scalar_lea.hbm %s5780_s7, 32 }
 0x5c3   :  { %p5470_p1 = scmp.ne.s32.totalorder %s5780_s7, %s5469_s6  ;;  %p5473_p2 = scmp.lt.u32.totalorder %s5469_s6, %s5780_s7 }
 0x5c5   :  { %p5475_p3 = pnand %p5473_p2, %p5470_p1 }
 0x5c7   :  { %5478 = shalt.err (!%p5475_p3)
}
 0x5c8   :  { %4035 = dma.vmem_to_hbm [thread:$0]  %s4033_s5, 32, %s5780_s7, [#allocation4]  }
 0x5c9   :  { %5483 = dma.done.wait [#allocation4], 32  }
 0x5ca   :  { %5484 = vsyncadd [#allocation4], 4294967264 }
 0x5cb   :  { %4039 = vsyncpa [#allocation3], 1 }
 0x5cc   :  { %4040 = vsyncpa [#allocation6], 1 }
 0x5cd   :  { %4041 = vsyncpa [#allocation4], 1 }

</bundles_post_ra>
